<compile_context>
chip_gen: v7x
topology: tpu7x:2x2x1
jax: 0.10.0
libtpu: 0.0.40
codegen_flags: <defaults>
</compile_context>

<pallas_src>
import math

import jax
import jax.numpy as jnp
from jax.experimental import pallas as pl
from jax.experimental.pallas import tpu as pltpu

SIZE = 32           # "size" argument of Crystal_Model
FEAT = 4 * SIZE     # 128 : fused lane width  [m_1 | m_2 | m_3 | m_4]
BATCH = 8


# ---------------------------------------------------------------------------
# activations
# ---------------------------------------------------------------------------
def _gelu_tanh(x):
    # tanh-form GELU (runs on the EUP).  PyTorch nn.GELU() default is the
    # exact erf form; the two differ by at most a few 1e-4 in absolute value.
    c = 0.7978845608028654
    return 0.5 * x * (1.0 + jnp.tanh(c * (x + 0.044715 * x * x * x)))


# ---------------------------------------------------------------------------
# Pallas kernel: 7 serial (8,128)@(128,128) matmuls with per-lane-group
# activations selected by a lane mask (no slicing / no concatenate).
# ---------------------------------------------------------------------------
def crystal_kernel(u_ref, w_ref, b_ref, sin_ref, out_ref):
    B, F = out_ref.shape
    S = F // 4

    lane = jax.lax.broadcasted_iota(jnp.int32, (B, F), 1)
    sin_mask = lane < S                                        # m_1 lanes
    tanh_mask = jnp.logical_and(lane >= 2 * S, lane < 3 * S)   # m_3 lanes
    deep_mask = lane >= 3 * S                                  # m_4 lanes

    def layer(x, i):
        return (jnp.dot(x, w_ref[i], preferred_element_type=jnp.float32)
                + b_ref[pl.ds(i, 1), :])

    def mixed_act(x, l):
        # lanes [0,S): Sin()   [S,2S): GELU   [2S,3S): Tanh   [3S,4S): GELU
        amp = sin_ref[pl.ds(3 * l + 0, 1), :]
        freq = sin_ref[pl.ds(3 * l + 1, 1), :]
        phase = sin_ref[pl.ds(3 * l + 2, 1), :]
        s = amp * jnp.sin(freq * x + phase)
        return jnp.where(sin_mask, s,
                         jnp.where(tanh_mask, jnp.tanh(x), _gelu_tanh(x)))

    h = u_ref[...]
    h = mixed_act(layer(h, 0), 0)      # branch layer 1 (fused Linear(5,·))
    h = mixed_act(layer(h, 1), 1)      # branch layer 2 (block-diag)
    h = mixed_act(layer(h, 2), 2)      # branch layer 3 (block-diag)

    # m_4 layers 4 and 5: identity blocks (+ zero bias) on the finished
    # m_1/m_2/m_3 lanes, Linear+GELU on the m_4 lanes.
    x = layer(h, 3)
    h = jnp.where(deep_mask, _gelu_tanh(x), x)
    x = layer(h, 4)
    h = jnp.where(deep_mask, _gelu_tanh(x), x)

    # final head: Linear(128,128)+GELU (m_3 Scale folded into its rows),
    # then Linear(128,3 zero-padded to 128)+Tanh (lane-dense output).
    h = _gelu_tanh(layer(h, 5))
    out_ref[...] = jnp.tanh(layer(h, 6))


# ---------------------------------------------------------------------------
# host-side prep (Sphere mapping + input concat) and wrapper
# ---------------------------------------------------------------------------
def _sphere(p):
    # matches the PyTorch Sphere module as written (z uses cos(p[0])).
    x = jnp.cos(p[0]) * jnp.sin(p[1])
    y = jnp.sin(p[0]) * jnp.sin(p[1])
    z = jnp.cos(p[0])
    return jnp.stack([x, y, z])


def _prep_input(u, s_in_p):
    s_in = _sphere(s_in_p)                                  # (3,)
    return jnp.concatenate(
        [u, jnp.broadcast_to(s_in, (u.shape[0], 3))], axis=-1)   # (B, 5)


def crystal_forward(u, packed):
    u5 = _prep_input(u, packed["s_in_p"])                   # (B, 5)
    B = u5.shape[0]
    Bp = ((B + 7) // 8) * 8                                 # sublane-pad batch
    u_pad = jnp.zeros((Bp, FEAT), jnp.float32).at[:B, :5].set(u5)

    vmem = pl.BlockSpec(memory_space=pltpu.MemorySpace.VMEM)
    out = pl.pallas_call(
        crystal_kernel,
        out_shape=jax.ShapeDtypeStruct((Bp, FEAT), jnp.float32),
        in_specs=[vmem, vmem, vmem, vmem],
        out_specs=vmem,
    )(u_pad, packed["w_stack"], packed["b_slab"], packed["sin_slab"])

    # final Scale() is post-tanh (cannot be folded into weights) -> apply on
    # the tiny sliced result in plain JAX.
    return out[:B, :3] * packed["scale_final"]


# ---------------------------------------------------------------------------
# deterministic parameter init (mimics the PyTorch module's init)
# ---------------------------------------------------------------------------
def init_params(key, size):
    keys = jax.random.split(key, 64)
    it = iter(keys)
    nk = lambda: next(it)

    def linear(fan_in, fan_out):
        bound = 1.0 / math.sqrt(fan_in)
        w = jax.random.uniform(nk(), (fan_in, fan_out), jnp.float32, -bound, bound)
        b = jax.random.uniform(nk(), (1, fan_out), jnp.float32, -bound, bound)
        return w, b

    s_in_p = 0.5 + 0.01 * jax.random.normal(nk(), (2,), jnp.float32)

    # m_1: Linear(5,s), Sin, Linear(s,s), Sin, Linear(s,s), Sin
    m1_w0, m1_b0 = linear(5, size)
    m1_w1, m1_b1 = linear(size, size)
    m1_w2, m1_b2 = linear(size, size)
    sin_rows = []
    for _ in range(3):
        sin_rows.append(1.0 + 0.01 * jax.random.normal(nk(), (size,), jnp.float32))  # amp
        sin_rows.append(1.0 + 0.01 * jax.random.normal(nk(), (size,), jnp.float32))  # freq
        sin_rows.append(0.01 * jax.random.normal(nk(), (size,), jnp.float32))        # phase
    m1_sin = jnp.stack(sin_rows, axis=0)                    # (9, size)

    # m_2: 3x Linear + GELU
    m2_w0, m2_b0 = linear(5, size)
    m2_w1, m2_b1 = linear(size, size)
    m2_w2, m2_b2 = linear(size, size)

    # m_3: 3x Linear + Tanh + Scale
    m3_w0, m3_b0 = linear(5, size)
    m3_w1, m3_b1 = linear(size, size)
    m3_w2, m3_b2 = linear(size, size)
    scale_m3 = 1.0 + 0.01 * jax.random.normal(nk(), (), jnp.float32)

    # m_4: 5x Linear + GELU
    m4_w0, m4_b0 = linear(5, size)
    m4_w1, m4_b1 = linear(size, size)
    m4_w2, m4_b2 = linear(size, size)
    m4_w3, m4_b3 = linear(size, size)
    m4_w4, m4_b4 = linear(size, size)

    # final: Linear(4s,4s), GELU, Linear(4s,3), Tanh, Scale
    f_w0, f_b0 = linear(4 * size, 4 * size)
    f_w1, f_b1 = linear(4 * size, 3)
    scale_final = 1.0 + 0.01 * jax.random.normal(nk(), (), jnp.float32)

    flat = (m1_w0, m1_b0, m1_w1, m1_b1, m1_w2, m1_b2, m1_sin,
            m2_w0, m2_b0, m2_w1, m2_b1, m2_w2, m2_b2,
            m3_w0, m3_b0, m3_w1, m3_b1, m3_w2, m3_b2,
            m4_w0, m4_b0, m4_w1, m4_b1, m4_w2, m4_b2, m4_w3, m4_b3, m4_w4, m4_b4,
            f_w0, f_b0, f_w1, f_b1)

    return {"s_in_p": s_in_p, "flat": flat,
            "scale_m3": scale_m3, "scale_final": scale_final}


# ---------------------------------------------------------------------------
# one-time packing of the 33 raw tensors into 4 kernel slabs
# ---------------------------------------------------------------------------
def pack_params(params, size=SIZE):
    (m1_w0, m1_b0, m1_w1, m1_b1, m1_w2, m1_b2, m1_sin,
     m2_w0, m2_b0, m2_w1, m2_b1, m2_w2, m2_b2,
     m3_w0, m3_b0, m3_w1, m3_b1, m3_w2, m3_b2,
     m4_w0, m4_b0, m4_w1, m4_b1, m4_w2, m4_b2, m4_w3, m4_b3, m4_w4, m4_b4,
     f_w0, f_b0, f_w1, f_b1) = params["flat"]
    F = 4 * size
    eye = jnp.eye(size, dtype=jnp.float32)
    z = jnp.zeros((size, size), jnp.float32)

    def blockdiag4(a, b, c, d):
        return jnp.block([[a, z, z, z],
                          [z, b, z, z],
                          [z, z, c, z],
                          [z, z, z, d]])

    # layer 0: fused input Linear(5 -> 4*size), zero-padded to (F, F) so the
    # zero-padded (B, F) input gives one uniform (B,F)@(F,F) matmul shape.
    w0 = jnp.zeros((F, F), jnp.float32).at[:5, :].set(
        jnp.concatenate([m1_w0, m2_w0, m3_w0, m4_w0], axis=1))
    b0 = jnp.concatenate([m1_b0, m2_b0, m3_b0, m4_b0], axis=1)[0]

    w1 = blockdiag4(m1_w1, m2_w1, m3_w1, m4_w1)
    b1 = jnp.concatenate([m1_b1, m2_b1, m3_b1, m4_b1], axis=1)[0]
    w2 = blockdiag4(m1_w2, m2_w2, m3_w2, m4_w2)
    b2 = jnp.concatenate([m1_b2, m2_b2, m3_b2, m4_b2], axis=1)[0]

    # m_4 layers 4/5: identity blocks + zero bias on the finished lanes.
    zb = jnp.zeros((1, 3 * size), jnp.float32)
    w3 = blockdiag4(eye, eye, eye, m4_w3)
    b3 = jnp.concatenate([zb, m4_b3], axis=1)[0]
    w4 = blockdiag4(eye, eye, eye, m4_w4)
    b4 = jnp.concatenate([zb, m4_b4], axis=1)[0]

    # final.Linear#0 with the m_3 Scale() folded into the rows that read h3
    # (h3 * s) @ W  ==  h3 @ (s * W_rows)   -- numerically equivalent.
    w5 = f_w0.at[2 * size:3 * size, :].multiply(params["scale_m3"])
    b5 = f_b0[0]

    # final.Linear#1 zero-padded (F,3) -> (F,F) for a lane-dense output.
    w6 = jnp.zeros((F, F), jnp.float32).at[:, :3].set(f_w1)
    b6 = jnp.zeros((F,), jnp.float32).at[:3].set(f_b1[0])

    w_stack = jnp.stack([w0, w1, w2, w3, w4, w5, w6])                # (7,F,F)
    b_slab = jnp.zeros((8, F), jnp.float32).at[:7].set(
        jnp.stack([b0, b1, b2, b3, b4, b5, b6]))                     # (8,F)
    sin_slab = jnp.zeros((9, F), jnp.float32).at[:, :size].set(m1_sin)  # (9,F)

    return {"s_in_p": params["s_in_p"],
            "w_stack": w_stack, "b_slab": b_slab, "sin_slab": sin_slab,
            "scale_final": params["scale_final"]}


# ---------------------------------------------------------------------------
# pure-JAX reference of the ORIGINAL unfused module (GELU passed in)
# ---------------------------------------------------------------------------
def crystal_reference(u, params, gelu):
    (m1_w0, m1_b0, m1_w1, m1_b1, m1_w2, m1_b2, m1_sin,
     m2_w0, m2_b0, m2_w1, m2_b1, m2_w2, m2_b2,
     m3_w0, m3_b0, m3_w1, m3_b1, m3_w2, m3_b2,
     m4_w0, m4_b0, m4_w1, m4_b1, m4_w2, m4_b2, m4_w3, m4_b3, m4_w4, m4_b4,
     f_w0, f_b0, f_w1, f_b1) = params["flat"]

    u5 = _prep_input(u, params["s_in_p"])
    hi = jax.lax.Precision.HIGHEST

    def lin(x, w, b):
        return jnp.dot(x, w, precision=hi) + b

    def sin_l(x, l):
        return m1_sin[3 * l] * jnp.sin(m1_sin[3 * l + 1] * x + m1_sin[3 * l + 2])

    h1 = sin_l(lin(u5, m1_w0, m1_b0), 0)
    h1 = sin_l(lin(h1, m1_w1, m1_b1), 1)
    h1 = sin_l(lin(h1, m1_w2, m1_b2), 2)

    h2 = gelu(lin(u5, m2_w0, m2_b0))
    h2 = gelu(lin(h2, m2_w1, m2_b1))
    h2 = gelu(lin(h2, m2_w2, m2_b2))

    h3 = jnp.tanh(lin(u5, m3_w0, m3_b0))
    h3 = jnp.tanh(lin(h3, m3_w1, m3_b1))
    h3 = jnp.tanh(lin(h3, m3_w2, m3_b2)) * params["scale_m3"]

    h4 = gelu(lin(u5, m4_w0, m4_b0))
    h4 = gelu(lin(h4, m4_w1, m4_b1))
    h4 = gelu(lin(h4, m4_w2, m4_b2))
    h4 = gelu(lin(h4, m4_w3, m4_b3))
    h4 = gelu(lin(h4, m4_w4, m4_b4))

    res = jnp.concatenate([h1, h2, h3, h4], axis=-1)
    f = gelu(lin(res, f_w0, f_b0))
    return jnp.tanh(lin(f, f_w1, f_b1)) * params["scale_final"]


if __name__ == "__main__":
    key = jax.random.PRNGKey(0)
    k_u, k_p = jax.random.split(key)

    u = jax.random.normal(k_u, (BATCH, 2), jnp.float32)   # Crystal_Model takes 2 input features
    params = init_params(k_p, SIZE)
    packed = pack_params(params)

    out = jax.jit(crystal_forward)(u, packed)
    out = jax.block_until_ready(out)
    assert out.shape == (BATCH, 3), out.shape

    # Structural check: same math as the original (unfused) module with the
    # same tanh-GELU -> verifies the block-diagonal fusion / folding / padding.
    ref_tanh = crystal_reference(u, params, _gelu_tanh)
    assert jnp.allclose(out, ref_tanh, atol=2e-3, rtol=2e-3), \
        float(jnp.max(jnp.abs(out - ref_tanh)))

    # Semantics check vs PyTorch's exact erf GELU (loose tolerance: only the
    # GELU approximation differs between the two).
    gelu_erf = lambda x: 0.5 * x * (1.0 + jax.scipy.special.erf(x * 0.7071067811865475))
    ref_erf = crystal_reference(u, params, gelu_erf)
    assert jnp.allclose(out, ref_erf, atol=3e-2, rtol=3e-2), \
        float(jnp.max(jnp.abs(out - ref_erf)))

    print("KERNEL_OK")
</pallas_src>

<mosaic_0001>
module attributes {stable_mosaic.version = 11 : i64} {
  func.func @crystal_kernel(%arg0: memref<8x128xf32, #tpu.memory_space<vmem>>, %arg1: memref<7x128x128xf32, #tpu.memory_space<vmem>>, %arg2: memref<8x128xf32, #tpu.memory_space<vmem>>, %arg3: memref<9x128xf32, #tpu.memory_space<vmem>>, %arg4: memref<8x128xf32, #tpu.memory_space<vmem>>) attributes {dimension_semantics = [], scalar_prefetch = 0 : i64, scratch_operands = 0 : i64, tpu.core_type = #tpu.core_type<tc>} {
    %0 = tpu.iota {dimensions = array<i32: 1>} : vector<8x128xi32>
    %c32_i32 = arith.constant 32 : i32
    %1 = vector.broadcast %c32_i32 : i32 to vector<8x128xi32>
    %2 = arith.cmpi slt, %0, %1 : vector<8x128xi32>
    %c64_i32 = arith.constant 64 : i32
    %3 = vector.broadcast %c64_i32 : i32 to vector<8x128xi32>
    %4 = arith.cmpi sge, %0, %3 : vector<8x128xi32>
    %c96_i32 = arith.constant 96 : i32
    %5 = vector.broadcast %c96_i32 : i32 to vector<8x128xi32>
    %6 = arith.cmpi slt, %0, %5 : vector<8x128xi32>
    %7 = arith.andi %4, %6 : vector<8x128xi1>
    %c96_i32_0 = arith.constant 96 : i32
    %8 = vector.broadcast %c96_i32_0 : i32 to vector<8x128xi32>
    %9 = arith.cmpi sge, %0, %8 : vector<8x128xi32>
    %c0 = arith.constant 0 : index
    %c0_1 = arith.constant 0 : index
    %10 = vector.load %arg0[%c0, %c0_1] : memref<8x128xf32, #tpu.memory_space<vmem>>, vector<8x128xf32>
    %c0_2 = arith.constant 0 : index
    %c0_3 = arith.constant 0 : index
    %c0_4 = arith.constant 0 : index
    %11 = vector.load %arg1[%c0_2, %c0_3, %c0_4] : memref<7x128x128xf32, #tpu.memory_space<vmem>>, vector<1x128x128xf32>
    %12 = vector.shape_cast %11 : vector<1x128x128xf32> to vector<128x128xf32>
    %cst = arith.constant dense<0.000000e+00> : vector<8x128xf32>
    %13 = tpu.matmul %10, %12, %cst {dimension_numbers = #tpu.dot_dimension_numbers<[1], [0], [0], [1], [0, 0, 1, 1], [], []>} : vector<8x128xf32>, vector<128x128xf32>, vector<8x128xf32> -> vector<8x128xf32>
    %c0_5 = arith.constant 0 : index
    %c0_6 = arith.constant 0 : index
    %14 = vector.load %arg2[%c0_5, %c0_6] : memref<8x128xf32, #tpu.memory_space<vmem>>, vector<1x128xf32>
    %15 = vector.broadcast %14 : vector<1x128xf32> to vector<8x128xf32>
    %16 = arith.addf %13, %15 : vector<8x128xf32>
    %c0_7 = arith.constant 0 : index
    %c0_8 = arith.constant 0 : index
    %17 = vector.load %arg3[%c0_7, %c0_8] : memref<9x128xf32, #tpu.memory_space<vmem>>, vector<1x128xf32>
    %c1 = arith.constant 1 : index
    %c0_9 = arith.constant 0 : index
    %18 = vector.load %arg3[%c1, %c0_9] : memref<9x128xf32, #tpu.memory_space<vmem>>, vector<1x128xf32>
    %c2 = arith.constant 2 : index
    %c0_10 = arith.constant 0 : index
    %19 = vector.load %arg3[%c2, %c0_10] : memref<9x128xf32, #tpu.memory_space<vmem>>, vector<1x128xf32>
    %20 = vector.broadcast %18 : vector<1x128xf32> to vector<8x128xf32>
    %21 = arith.mulf %20, %16 : vector<8x128xf32>
    %22 = vector.broadcast %19 : vector<1x128xf32> to vector<8x128xf32>
    %23 = arith.addf %21, %22 : vector<8x128xf32>
    %24 = math.sin %23 : vector<8x128xf32>
    %25 = vector.broadcast %17 : vector<1x128xf32> to vector<8x128xf32>
    %26 = arith.mulf %25, %24 : vector<8x128xf32>
    %27 = math.tanh %16 : vector<8x128xf32>
    %cst_11 = arith.constant 5.000000e-01 : f32
    %28 = vector.broadcast %cst_11 : f32 to vector<8x128xf32>
    %29 = arith.mulf %28, %16 : vector<8x128xf32>
    %cst_12 = arith.constant 4.471500e-02 : f32
    %30 = vector.broadcast %cst_12 : f32 to vector<8x128xf32>
    %31 = arith.mulf %30, %16 : vector<8x128xf32>
    %32 = arith.mulf %31, %16 : vector<8x128xf32>
    %33 = arith.mulf %32, %16 : vector<8x128xf32>
    %34 = arith.addf %16, %33 : vector<8x128xf32>
    %cst_13 = arith.constant 0.797884583 : f32
    %35 = vector.broadcast %cst_13 : f32 to vector<8x128xf32>
    %36 = arith.mulf %35, %34 : vector<8x128xf32>
    %37 = math.tanh %36 : vector<8x128xf32>
    %cst_14 = arith.constant 1.000000e+00 : f32
    %38 = vector.broadcast %cst_14 : f32 to vector<8x128xf32>
    %39 = arith.addf %38, %37 : vector<8x128xf32>
    %40 = arith.mulf %29, %39 : vector<8x128xf32>
    %41 = arith.select %7, %27, %40 : vector<8x128xi1>, vector<8x128xf32>
    %42 = arith.select %2, %26, %41 : vector<8x128xi1>, vector<8x128xf32>
    %c1_15 = arith.constant 1 : index
    %c0_16 = arith.constant 0 : index
    %c0_17 = arith.constant 0 : index
    %43 = vector.load %arg1[%c1_15, %c0_16, %c0_17] : memref<7x128x128xf32, #tpu.memory_space<vmem>>, vector<1x128x128xf32>
    %44 = vector.shape_cast %43 : vector<1x128x128xf32> to vector<128x128xf32>
    %cst_18 = arith.constant dense<0.000000e+00> : vector<8x128xf32>
    %45 = tpu.matmul %42, %44, %cst_18 {dimension_numbers = #tpu.dot_dimension_numbers<[1], [0], [0], [1], [0, 0, 1, 1], [], []>} : vector<8x128xf32>, vector<128x128xf32>, vector<8x128xf32> -> vector<8x128xf32>
    %c1_19 = arith.constant 1 : index
    %c0_20 = arith.constant 0 : index
    %46 = vector.load %arg2[%c1_19, %c0_20] : memref<8x128xf32, #tpu.memory_space<vmem>>, vector<1x128xf32>
    %47 = vector.broadcast %46 : vector<1x128xf32> to vector<8x128xf32>
    %48 = arith.addf %45, %47 : vector<8x128xf32>
    %c3 = arith.constant 3 : index
    %c0_21 = arith.constant 0 : index
    %49 = vector.load %arg3[%c3, %c0_21] : memref<9x128xf32, #tpu.memory_space<vmem>>, vector<1x128xf32>
    %c4 = arith.constant 4 : index
    %c0_22 = arith.constant 0 : index
    %50 = vector.load %arg3[%c4, %c0_22] : memref<9x128xf32, #tpu.memory_space<vmem>>, vector<1x128xf32>
    %c5 = arith.constant 5 : index
    %c0_23 = arith.constant 0 : index
    %51 = vector.load %arg3[%c5, %c0_23] : memref<9x128xf32, #tpu.memory_space<vmem>>, vector<1x128xf32>
    %52 = vector.broadcast %50 : vector<1x128xf32> to vector<8x128xf32>
    %53 = arith.mulf %52, %48 : vector<8x128xf32>
    %54 = vector.broadcast %51 : vector<1x128xf32> to vector<8x128xf32>
    %55 = arith.addf %53, %54 : vector<8x128xf32>
    %56 = math.sin %55 : vector<8x128xf32>
    %57 = vector.broadcast %49 : vector<1x128xf32> to vector<8x128xf32>
    %58 = arith.mulf %57, %56 : vector<8x128xf32>
    %59 = math.tanh %48 : vector<8x128xf32>
    %cst_24 = arith.constant 5.000000e-01 : f32
    %60 = vector.broadcast %cst_24 : f32 to vector<8x128xf32>
    %61 = arith.mulf %60, %48 : vector<8x128xf32>
    %cst_25 = arith.constant 4.471500e-02 : f32
    %62 = vector.broadcast %cst_25 : f32 to vector<8x128xf32>
    %63 = arith.mulf %62, %48 : vector<8x128xf32>
    %64 = arith.mulf %63, %48 : vector<8x128xf32>
    %65 = arith.mulf %64, %48 : vector<8x128xf32>
    %66 = arith.addf %48, %65 : vector<8x128xf32>
    %cst_26 = arith.constant 0.797884583 : f32
    %67 = vector.broadcast %cst_26 : f32 to vector<8x128xf32>
    %68 = arith.mulf %67, %66 : vector<8x128xf32>
    %69 = math.tanh %68 : vector<8x128xf32>
    %cst_27 = arith.constant 1.000000e+00 : f32
    %70 = vector.broadcast %cst_27 : f32 to vector<8x128xf32>
    %71 = arith.addf %70, %69 : vector<8x128xf32>
    %72 = arith.mulf %61, %71 : vector<8x128xf32>
    %73 = arith.select %7, %59, %72 : vector<8x128xi1>, vector<8x128xf32>
    %74 = arith.select %2, %58, %73 : vector<8x128xi1>, vector<8x128xf32>
    %c2_28 = arith.constant 2 : index
    %c0_29 = arith.constant 0 : index
    %c0_30 = arith.constant 0 : index
    %75 = vector.load %arg1[%c2_28, %c0_29, %c0_30] : memref<7x128x128xf32, #tpu.memory_space<vmem>>, vector<1x128x128xf32>
    %76 = vector.shape_cast %75 : vector<1x128x128xf32> to vector<128x128xf32>
    %cst_31 = arith.constant dense<0.000000e+00> : vector<8x128xf32>
    %77 = tpu.matmul %74, %76, %cst_31 {dimension_numbers = #tpu.dot_dimension_numbers<[1], [0], [0], [1], [0, 0, 1, 1], [], []>} : vector<8x128xf32>, vector<128x128xf32>, vector<8x128xf32> -> vector<8x128xf32>
    %c2_32 = arith.constant 2 : index
    %c0_33 = arith.constant 0 : index
    %78 = vector.load %arg2[%c2_32, %c0_33] : memref<8x128xf32, #tpu.memory_space<vmem>>, vector<1x128xf32>
    %79 = vector.broadcast %78 : vector<1x128xf32> to vector<8x128xf32>
    %80 = arith.addf %77, %79 : vector<8x128xf32>
    %c6 = arith.constant 6 : index
    %c0_34 = arith.constant 0 : index
    %81 = vector.load %arg3[%c6, %c0_34] : memref<9x128xf32, #tpu.memory_space<vmem>>, vector<1x128xf32>
    %c7 = arith.constant 7 : index
    %c0_35 = arith.constant 0 : index
    %82 = vector.load %arg3[%c7, %c0_35] : memref<9x128xf32, #tpu.memory_space<vmem>>, vector<1x128xf32>
    %c8 = arith.constant 8 : index
    %c0_36 = arith.constant 0 : index
    %83 = vector.load %arg3[%c8, %c0_36] : memref<9x128xf32, #tpu.memory_space<vmem>>, vector<1x128xf32>
    %84 = vector.broadcast %82 : vector<1x128xf32> to vector<8x128xf32>
    %85 = arith.mulf %84, %80 : vector<8x128xf32>
    %86 = vector.broadcast %83 : vector<1x128xf32> to vector<8x128xf32>
    %87 = arith.addf %85, %86 : vector<8x128xf32>
    %88 = math.sin %87 : vector<8x128xf32>
    %89 = vector.broadcast %81 : vector<1x128xf32> to vector<8x128xf32>
    %90 = arith.mulf %89, %88 : vector<8x128xf32>
    %91 = math.tanh %80 : vector<8x128xf32>
    %cst_37 = arith.constant 5.000000e-01 : f32
    %92 = vector.broadcast %cst_37 : f32 to vector<8x128xf32>
    %93 = arith.mulf %92, %80 : vector<8x128xf32>
    %cst_38 = arith.constant 4.471500e-02 : f32
    %94 = vector.broadcast %cst_38 : f32 to vector<8x128xf32>
    %95 = arith.mulf %94, %80 : vector<8x128xf32>
    %96 = arith.mulf %95, %80 : vector<8x128xf32>
    %97 = arith.mulf %96, %80 : vector<8x128xf32>
    %98 = arith.addf %80, %97 : vector<8x128xf32>
    %cst_39 = arith.constant 0.797884583 : f32
    %99 = vector.broadcast %cst_39 : f32 to vector<8x128xf32>
    %100 = arith.mulf %99, %98 : vector<8x128xf32>
    %101 = math.tanh %100 : vector<8x128xf32>
    %cst_40 = arith.constant 1.000000e+00 : f32
    %102 = vector.broadcast %cst_40 : f32 to vector<8x128xf32>
    %103 = arith.addf %102, %101 : vector<8x128xf32>
    %104 = arith.mulf %93, %103 : vector<8x128xf32>
    %105 = arith.select %7, %91, %104 : vector<8x128xi1>, vector<8x128xf32>
    %106 = arith.select %2, %90, %105 : vector<8x128xi1>, vector<8x128xf32>
    %c3_41 = arith.constant 3 : index
    %c0_42 = arith.constant 0 : index
    %c0_43 = arith.constant 0 : index
    %107 = vector.load %arg1[%c3_41, %c0_42, %c0_43] : memref<7x128x128xf32, #tpu.memory_space<vmem>>, vector<1x128x128xf32>
    %108 = vector.shape_cast %107 : vector<1x128x128xf32> to vector<128x128xf32>
    %cst_44 = arith.constant dense<0.000000e+00> : vector<8x128xf32>
    %109 = tpu.matmul %106, %108, %cst_44 {dimension_numbers = #tpu.dot_dimension_numbers<[1], [0], [0], [1], [0, 0, 1, 1], [], []>} : vector<8x128xf32>, vector<128x128xf32>, vector<8x128xf32> -> vector<8x128xf32>
    %c3_45 = arith.constant 3 : index
    %c0_46 = arith.constant 0 : index
    %110 = vector.load %arg2[%c3_45, %c0_46] : memref<8x128xf32, #tpu.memory_space<vmem>>, vector<1x128xf32>
    %111 = vector.broadcast %110 : vector<1x128xf32> to vector<8x128xf32>
    %112 = arith.addf %109, %111 : vector<8x128xf32>
    %cst_47 = arith.constant 5.000000e-01 : f32
    %113 = vector.broadcast %cst_47 : f32 to vector<8x128xf32>
    %114 = arith.mulf %113, %112 : vector<8x128xf32>
    %cst_48 = arith.constant 4.471500e-02 : f32
    %115 = vector.broadcast %cst_48 : f32 to vector<8x128xf32>
    %116 = arith.mulf %115, %112 : vector<8x128xf32>
    %117 = arith.mulf %116, %112 : vector<8x128xf32>
    %118 = arith.mulf %117, %112 : vector<8x128xf32>
    %119 = arith.addf %112, %118 : vector<8x128xf32>
    %cst_49 = arith.constant 0.797884583 : f32
    %120 = vector.broadcast %cst_49 : f32 to vector<8x128xf32>
    %121 = arith.mulf %120, %119 : vector<8x128xf32>
    %122 = math.tanh %121 : vector<8x128xf32>
    %cst_50 = arith.constant 1.000000e+00 : f32
    %123 = vector.broadcast %cst_50 : f32 to vector<8x128xf32>
    %124 = arith.addf %123, %122 : vector<8x128xf32>
    %125 = arith.mulf %114, %124 : vector<8x128xf32>
    %126 = arith.select %9, %125, %112 : vector<8x128xi1>, vector<8x128xf32>
    %c4_51 = arith.constant 4 : index
    %c0_52 = arith.constant 0 : index
    %c0_53 = arith.constant 0 : index
    %127 = vector.load %arg1[%c4_51, %c0_52, %c0_53] : memref<7x128x128xf32, #tpu.memory_space<vmem>>, vector<1x128x128xf32>
    %128 = vector.shape_cast %127 : vector<1x128x128xf32> to vector<128x128xf32>
    %cst_54 = arith.constant dense<0.000000e+00> : vector<8x128xf32>
    %129 = tpu.matmul %126, %128, %cst_54 {dimension_numbers = #tpu.dot_dimension_numbers<[1], [0], [0], [1], [0, 0, 1, 1], [], []>} : vector<8x128xf32>, vector<128x128xf32>, vector<8x128xf32> -> vector<8x128xf32>
    %c4_55 = arith.constant 4 : index
    %c0_56 = arith.constant 0 : index
    %130 = vector.load %arg2[%c4_55, %c0_56] : memref<8x128xf32, #tpu.memory_space<vmem>>, vector<1x128xf32>
    %131 = vector.broadcast %130 : vector<1x128xf32> to vector<8x128xf32>
    %132 = arith.addf %129, %131 : vector<8x128xf32>
    %cst_57 = arith.constant 5.000000e-01 : f32
    %133 = vector.broadcast %cst_57 : f32 to vector<8x128xf32>
    %134 = arith.mulf %133, %132 : vector<8x128xf32>
    %cst_58 = arith.constant 4.471500e-02 : f32
    %135 = vector.broadcast %cst_58 : f32 to vector<8x128xf32>
    %136 = arith.mulf %135, %132 : vector<8x128xf32>
    %137 = arith.mulf %136, %132 : vector<8x128xf32>
    %138 = arith.mulf %137, %132 : vector<8x128xf32>
    %139 = arith.addf %132, %138 : vector<8x128xf32>
    %cst_59 = arith.constant 0.797884583 : f32
    %140 = vector.broadcast %cst_59 : f32 to vector<8x128xf32>
    %141 = arith.mulf %140, %139 : vector<8x128xf32>
    %142 = math.tanh %141 : vector<8x128xf32>
    %cst_60 = arith.constant 1.000000e+00 : f32
    %143 = vector.broadcast %cst_60 : f32 to vector<8x128xf32>
    %144 = arith.addf %143, %142 : vector<8x128xf32>
    %145 = arith.mulf %134, %144 : vector<8x128xf32>
    %146 = arith.select %9, %145, %132 : vector<8x128xi1>, vector<8x128xf32>
    %c5_61 = arith.constant 5 : index
    %c0_62 = arith.constant 0 : index
    %c0_63 = arith.constant 0 : index
    %147 = vector.load %arg1[%c5_61, %c0_62, %c0_63] : memref<7x128x128xf32, #tpu.memory_space<vmem>>, vector<1x128x128xf32>
    %148 = vector.shape_cast %147 : vector<1x128x128xf32> to vector<128x128xf32>
    %cst_64 = arith.constant dense<0.000000e+00> : vector<8x128xf32>
    %149 = tpu.matmul %146, %148, %cst_64 {dimension_numbers = #tpu.dot_dimension_numbers<[1], [0], [0], [1], [0, 0, 1, 1], [], []>} : vector<8x128xf32>, vector<128x128xf32>, vector<8x128xf32> -> vector<8x128xf32>
    %c5_65 = arith.constant 5 : index
    %c0_66 = arith.constant 0 : index
    %150 = vector.load %arg2[%c5_65, %c0_66] : memref<8x128xf32, #tpu.memory_space<vmem>>, vector<1x128xf32>
    %151 = vector.broadcast %150 : vector<1x128xf32> to vector<8x128xf32>
    %152 = arith.addf %149, %151 : vector<8x128xf32>
    %cst_67 = arith.constant 5.000000e-01 : f32
    %153 = vector.broadcast %cst_67 : f32 to vector<8x128xf32>
    %154 = arith.mulf %153, %152 : vector<8x128xf32>
    %cst_68 = arith.constant 4.471500e-02 : f32
    %155 = vector.broadcast %cst_68 : f32 to vector<8x128xf32>
    %156 = arith.mulf %155, %152 : vector<8x128xf32>
    %157 = arith.mulf %156, %152 : vector<8x128xf32>
    %158 = arith.mulf %157, %152 : vector<8x128xf32>
    %159 = arith.addf %152, %158 : vector<8x128xf32>
    %cst_69 = arith.constant 0.797884583 : f32
    %160 = vector.broadcast %cst_69 : f32 to vector<8x128xf32>
    %161 = arith.mulf %160, %159 : vector<8x128xf32>
    %162 = math.tanh %161 : vector<8x128xf32>
    %cst_70 = arith.constant 1.000000e+00 : f32
    %163 = vector.broadcast %cst_70 : f32 to vector<8x128xf32>
    %164 = arith.addf %163, %162 : vector<8x128xf32>
    %165 = arith.mulf %154, %164 : vector<8x128xf32>
    %c6_71 = arith.constant 6 : index
    %c0_72 = arith.constant 0 : index
    %c0_73 = arith.constant 0 : index
    %166 = vector.load %arg1[%c6_71, %c0_72, %c0_73] : memref<7x128x128xf32, #tpu.memory_space<vmem>>, vector<1x128x128xf32>
    %167 = vector.shape_cast %166 : vector<1x128x128xf32> to vector<128x128xf32>
    %cst_74 = arith.constant dense<0.000000e+00> : vector<8x128xf32>
    %168 = tpu.matmul %165, %167, %cst_74 {dimension_numbers = #tpu.dot_dimension_numbers<[1], [0], [0], [1], [0, 0, 1, 1], [], []>} : vector<8x128xf32>, vector<128x128xf32>, vector<8x128xf32> -> vector<8x128xf32>
    %c6_75 = arith.constant 6 : index
    %c0_76 = arith.constant 0 : index
    %169 = vector.load %arg2[%c6_75, %c0_76] : memref<8x128xf32, #tpu.memory_space<vmem>>, vector<1x128xf32>
    %170 = vector.broadcast %169 : vector<1x128xf32> to vector<8x128xf32>
    %171 = arith.addf %168, %170 : vector<8x128xf32>
    %172 = math.tanh %171 : vector<8x128xf32>
    %c0_77 = arith.constant 0 : index
    %c0_78 = arith.constant 0 : index
    %173 = vector.load %arg4[%c0_77, %c0_78] : memref<8x128xf32, #tpu.memory_space<vmem>>, vector<8x128xf32>
    tpu.vector_store %arg4[%c0_77, %c0_78], %172 {strides = array<i32>} : memref<8x128xf32, #tpu.memory_space<vmem>>, vector<8x128xf32>,
    return
  }
}

</mosaic_0001>

<bundles_post_ra>
// kernel: crystal_forward.1
= control target key start
LH: loop header
LB: loop body
LE: loop exit
PB: predicated region body
PF: predicated region fallthrough
CT: control target
= control target key end

     0   :  { %9 = vsyncpa [#allocation3], 0  ;;  %s1760_s15 = smov [#allocation2]   ;;  %s2071_s0 = inlined_call_operand.vmem [shape: f32[8,128], index: 0, kind: input, shape index: {}]   ;;  %s2072_s1 = inlined_call_operand.hbm [shape: f32[7,128,128], index: 1, kind: input, shape index: {}]   ;;  %s2073_s2 = inlined_call_operand.vmem [shape: f32[8,128], index: 2, kind: input, shape index: {}]   ;;  %s2074_s3 = inlined_call_operand.vmem [shape: f32[9,128], index: 3, kind: input, shape index: {}]   ;;  %s2075_s4 = inlined_call_operand.vmem [shape: f32[8,128], index: 4, kind: output, shape index: {}]  }
   0x1   :  { %s17_s16 = sshll.u32 %s1760_s15, 4  ;;  %s1736_s19 = scalar_lea.hbm %s2072_s1, 14336  ;;  %s18_s16 = int_to_ptr.vmem [resolvable:$true] %s17_s16 }
   0x2   :  { %p1737_p0 = scmp.ne.s32.totalorder %s2072_s1, %s1736_s19  ;;  %p1740_p1 = scmp.lt.u32.totalorder %s1736_s19, %s2072_s1 }
   0x4   :  { %p1742_p2 = pnand %p1740_p1, %p1737_p0 }
   0x6   :  { %1745 = shalt.err (!%p1742_p2)
}
   0x7   :  { %s1746_s24 = scalar_lea.vmem %s18_s16, 14336  ;;  %p1751_p4 = scmp.lt.s32.totalorder %s18_s16, %s18_s16 }
   0x8   :  { %p1747_p3 = scmp.ne.s32.totalorder %s18_s16, %s1746_s24  ;;  %p1752_p5 = scmp.lt.s32.totalorder %s1746_s24, %s1746_s24 }
   0xa   :  { %p1753_p6 = por %p1752_p5, %p1751_p4 }
   0xc   :  { %p1754_p7 = pnand %p1753_p6, %p1747_p3 }
   0xe   :  { %1757 = shalt.err (!%p1754_p7)
}
   0xf   :  { %s1761_s25 = smov 128   ;;  %s1762_s26 = smov 8  }
  0x10   :  { %23 = dma.hbm_to_vmem [thread:$0]  %s2072_s1, 14336, %s18_s16, [#allocation3], %s1761_s25, %s1761_s25, %s1762_s26  }
  0x11   :  { %1758 = dma.done.wait [#allocation3], 14336  }
  0x12   :  { %1759 = vsyncadd [#allocation3], 4294952960  ;;  %v1763_v0 = vmov 0.0|0.0   ;;  %vm1764_vm0 = vmmov 0   ;;  %v1765_v1 = vmov 0.0   ;;  %v39_v2 = vld [vmem:[#allocation2] sm:$0xff]  ;;  %v31_v62 = vlaneseq }
  0x13   :  { %1512 = vmatprep.subr.bf16.mxu0 %v1763_v0  ;;  %1299 = vmatprep.mubr.msk.f32.mxu0 %vm1764_vm0, %v1765_v1  ;;  %v40_v3 = vld [vmem:[#allocation2 + $0x8] sm:$0xff]  ;;  %v41_v4 = vld [vmem:[#allocation2 + $0x10] sm:$0xff]  ;;  %v42_v6 = vld [vmem:[#allocation2 + $0x18] sm:$0xff] }
  0x14   :  { %1536 = vmatprep.subr.bf16.mxu1 %v1763_v0  ;;  %1334 = vmatprep.mubr.msk.f32.mxu1 %vm1764_vm0, %v1765_v1  ;;  %v1513_v5 = vpack.c.bf16 %v40_v3, %v39_v2  ;;  %v1516_v7 = vpack.c.bf16 %v42_v6, %v41_v4  ;;  %v43_v8 = vld [vmem:[#allocation2 + $0x20] sm:$0xff]  ;;  %v44_v9 = vld [vmem:[#allocation2 + $0x28] sm:$0xff]  ;;  %v45_v11 = vld [vmem:[#allocation2 + $0x30] sm:$0xff]  ;;  %v1849_v6 = vand.u32 127, %v31_v62 }
  0x15   :  { %v1519_v10 = vpack.c.bf16 %v44_v9, %v43_v8  ;;  %v46_v12 = vld [vmem:[#allocation2 + $0x38] sm:$0xff]  ;;  %v47_v14 = vld [vmem:[#allocation2 + $0x40] sm:$0xff]  ;;  %v48_v15 = vld [vmem:[#allocation2 + $0x48] sm:$0xff] }
  0x16   :  { %1514 = vmatpush3.bf16.msra.mxu0 %v1513_v5  ;;  %v1522_v13 = vpack.c.bf16 %v46_v12, %v45_v11  ;;  %v1525_v16 = vpack.c.bf16 %v48_v15, %v47_v14  ;;  %v49_v17 = vld [vmem:[#allocation2 + $0x50] sm:$0xff]  ;;  %v50_v18 = vld [vmem:[#allocation2 + $0x58] sm:$0xff]  ;;  %v51_v20 = vld [vmem:[#allocation2 + $0x60] sm:$0xff]  ;;  %vm34_vm2 = vcmp.ge.s32.totalorder %v1849_v6, 64  ;;  %vm35_vm3 = vcmp.lt.s32.totalorder %v1849_v6, 96 }
  0x17   :  { %1515 = vmatprep.subr.bf16.mxu0 %v1763_v0  ;;  %v1528_v19 = vpack.c.bf16 %v50_v18, %v49_v17  ;;  %v52_v21 = vld [vmem:[#allocation2 + $0x68] sm:$0xff]  ;;  %v53_v23 = vld [vmem:[#allocation2 + $0x70] sm:$0xff]  ;;  %v54_v24 = vld [vmem:[#allocation2 + $0x78] sm:$0xff]  ;;  %v1766_v15 = vmov 683565275  }
  0x18   :  { %v1531_v22 = vpack.c.bf16 %v52_v21, %v51_v20  ;;  %v1534_v25 = vpack.c.bf16 %v54_v24, %v53_v23  ;;  %v38_v26 = vld [vmem:[%s2071_s0] sm:$0xff]  ;;  %v266_v28 = vld [vmem:[#allocation2 + $0x88] sm:$0xff]  ;;  %v267_v29 = vld [vmem:[#allocation2 + $0x90] sm:$0xff]  ;;  %v1767_v17 = vmov 2475754826  }
  0x19   :  { %v265_v27 = vld [vmem:[#allocation2 + $0x80] sm:$0xff]  ;;  %v268_v31 = vld [vmem:[#allocation2 + $0x98] sm:$0xff]  ;;  %v270_v34 = vld [vmem:[#allocation2 + $0xa8] sm:$0xff]  ;;  %v1768_v21 = vmov 2131351028  }
  0x1a   :  { %1517 = vmatpush3.bf16.msra.mxu0 %v1516_v7  ;;  %v1537_v30 = vpack.c.bf16 %v266_v28, %v265_v27  ;;  %v1540_v32 = vpack.c.bf16 %v268_v31, %v267_v29  ;;  %v269_v33 = vld [vmem:[#allocation2 + $0xa0] sm:$0xff]  ;;  %v271_v36 = vld [vmem:[#allocation2 + $0xb0] sm:$0xff]  ;;  %v272_v37 = vld [vmem:[#allocation2 + $0xb8] sm:$0xff]  ;;  %v1769_v24 = vmov 2102212464  }
  0x1b   :  { %1518 = vmatprep.subr.bf16.mxu0 %v1763_v0  ;;  %v1543_v35 = vpack.c.bf16 %v270_v34, %v269_v33  ;;  %v1546_v38 = vpack.c.bf16 %v272_v37, %v271_v36  ;;  %v273_v39 = vld [vmem:[#allocation2 + $0xc0] sm:$0xff]  ;;  %v274_v40 = vld [vmem:[#allocation2 + $0xc8] sm:$0xff]  ;;  %v275_v42 = vld [vmem:[#allocation2 + $0xd0] sm:$0xff]  ;;  %v1770_v27 = vmov 920167782  }
  0x1c   :  { %1538 = vmatpush3.bf16.msra.mxu1 %v1537_v30  ;;  %v1549_v41 = vpack.c.bf16 %v274_v40, %v273_v39  ;;  %v276_v43 = vld [vmem:[#allocation2 + $0xd8] sm:$0xff]  ;;  %v277_v45 = vld [vmem:[#allocation2 + $0xe0] sm:$0xff]  ;;  %v278_v46 = vld [vmem:[#allocation2 + $0xe8] sm:$0xff]  ;;  %v1771_v30 = vmov 1326507024  }
  0x1d   :  { %1539 = vmatprep.subr.bf16.mxu1 %v1763_v0  ;;  %v1552_v44 = vpack.c.bf16 %v276_v43, %v275_v42  ;;  %v1555_v47 = vpack.c.bf16 %v278_v46, %v277_v45  ;;  %v279_v48 = vld [vmem:[#allocation2 + $0xf0] sm:$0xff]  ;;  %v280_v49 = vld [vmem:[#allocation2 + $0xf8] sm:$0xff]  ;;  %v1120_v51 = vld [vmem:[%s2073_s2] ss:$0 sm:$0xff] }
  0x1e   :  { %1520 = vmatpush3.bf16.msra.mxu0 %v1519_v10  ;;  %v1558_v50 = vpack.c.bf16 %v280_v49, %v279_v48  ;;  %v1121_v53 = vld [vmem:[%s2074_s3 + $0x1] ss:$0 sm:$0xff]  ;;  %v1122_v56 = vld [vmem:[%s2074_s3 + $0x2] ss:$0 sm:$0xff]  ;;  %vm1870_vm7 = vmand %vm34_vm2, %vm35_vm3  ;;  %vm33_vm2 = vcmp.lt.s32.totalorder %v1849_v6, 32 }
  0x1f   :  { %1521 = vmatprep.subr.bf16.mxu0 %v1763_v0 }
  0x20   :  { %1541 = vmatpush3.bf16.msra.mxu1 %v1540_v32 }
  0x21   :  { %1542 = vmatprep.subr.bf16.mxu1 %v1763_v0 }
  0x22   :  { %1523 = vmatpush3.bf16.msra.mxu0 %v1522_v13 }
  0x23   :  { %1524 = vmatprep.subr.bf16.mxu0 %v1763_v0 }
  0x24   :  { %1544 = vmatpush3.bf16.msra.mxu1 %v1543_v35 }
  0x25   :  { %1545 = vmatprep.subr.bf16.mxu1 %v1763_v0 }
  0x26   :  { %1526 = vmatpush3.bf16.msra.mxu0 %v1525_v16 }
  0x27   :  { %1527 = vmatprep.subr.bf16.mxu0 %v1763_v0 }
  0x28   :  { %1547 = vmatpush3.bf16.msra.mxu1 %v1546_v38 }
  0x29   :  { %1548 = vmatprep.subr.bf16.mxu1 %v1763_v0 }
  0x2a   :  { %1529 = vmatpush3.bf16.msra.mxu0 %v1528_v19 }
  0x2b   :  { %1530 = vmatprep.subr.bf16.mxu0 %v1763_v0 }
  0x2c   :  { %1550 = vmatpush3.bf16.msra.mxu1 %v1549_v41 }
  0x2d   :  { %1551 = vmatprep.subr.bf16.mxu1 %v1763_v0 }
  0x2e   :  { %1532 = vmatpush3.bf16.msra.mxu0 %v1531_v22 }
  0x2f   :  { %1533 = vmatprep.subr.bf16.mxu0 %v1763_v0 }
  0x30   :  { %1553 = vmatpush3.bf16.msra.mxu1 %v1552_v44 }
  0x31   :  { %1554 = vmatprep.subr.bf16.mxu1 %v1763_v0 }
  0x32   :  { %1535 = vmatpush3.bf16.msra.mxu0 %v1534_v25 }
  0x33   :  { %1560 = vmatprep.subr.bf16.mxu0 %v1763_v0 }
  0x34   :  { %1556 = vmatpush3.bf16.msra.mxu1 %v1555_v47 }
  0x35   :  { %1300 = vmatmul.mubr.f32.vlgmr.msra.gmra.mrb[0].mxu0 %v38_v26  ;;  %1557 = vmatprep.subr.bf16.mxu1 %v1763_v0 }
  0x36   :  { %1369 = vmatprep.mubr.msk.f32.mxu0 %vm1764_vm0, %v1765_v1 }
  0x38   :  { %1559 = vmatpush3.bf16.msra.mxu1 %v1558_v50 }
  0x39   :  { %1584 = vmatprep.subr.bf16.mxu1 %v1763_v0 }
 0x108   :  { %v126_v52 = vpop.f32.mrb[0].mxu0 }
 0x109   :  { %v127_v54 = vadd.f32 %v1120_v51, %v126_v52  ;;  %v1301_v55 = vpop.f32.mrb[1].mxu0 }
 0x10b   :  { %v137_v57 = vmul.f32 %v1121_v53, %v127_v54  ;;  %v254_v58 = vmul.f32 0.044715, %v127_v54  ;;  %v253_v19 = vmul.f32 0.5, %v127_v54 }
 0x10d   :  { %v1845_v59 = vadd.f32 %v1122_v56, %v137_v57  ;;  %v255_v60 = vmul.f32 %v254_v58, %v127_v54 }
 0x10f   :  { %v146_v61 = vand.u32 2139095040, %v1845_v59  ;;  %v256_v63 = vmul.f32 %v255_v60, %v127_v54  ;;  %v143_v4 = vand.u32 2147483647, %v1845_v59  ;;  %vm145_vm11 = vcmp.lt.s32.totalorder %v1845_v59, 0 }
 0x111   :  { %v147_v2 = vshrl.u32 %v146_v61, 23  ;;  %v257_v3 = vadd.f32 %v256_v63, %v127_v54  ;;  %v150_v9 = vand.u32 8388607, %v143_v4  ;;  %vm144_vm12 = vcmp.le.f32.partialorder %v143_v4, 0.7853982 }
 0x112   :  { %v1127_v4 = vld [vmem:[%s2074_s3] ss:$0 sm:$0xff] }
 0x113   :  { %v1123_v5 = vadd.s32 4294967169, %v147_v2  ;;  %v258_v7 = vmul.f32 0.7978846, %v257_v3  ;;  %v151_v12 = vor.u32 8388608, %v150_v9 }
 0x115   :  { %v153_v8 = vadd.s32 1, %v1123_v5  ;;  %1704 = vtanh.f32 %v258_v7  ;;  %v191_v35 = vshll.u32 %v151_v12, 8 }
 0x116   :  { %1706 = vtanh.f32 %v127_v54 }
 0x117   :  { %vm154_vm1 = vcmp.gt.s32.totalorder %v153_v8, 0 }
 0x118   :  { %v155_v10 = vsel %vm154_vm1, %v153_v8, 0  ;;  %vm235_vm1 = vweird.f32 %v1845_v59 }
 0x119   :  { %v157_v11 = vand.u32 31, %v155_v10  ;;  %v156_v14 = vshrl.u32 %v155_v10, 5 }
 0x11b   :  { %v158_v13 = vsub.s32 32, %v157_v11  ;;  %v160_v16 = vshll.u32 %v1766_v15, %v157_v11  ;;  %v163_v18 = vshll.u32 %v1767_v17, %v157_v11  ;;  %v166_v23 = vshll.u32 %v1768_v21, %v157_v11 }
 0x11c   :  { %v169_v26 = vshll.u32 %v1769_v24, %v157_v11  ;;  %v172_v29 = vshll.u32 %v1770_v27, %v157_v11  ;;  %vm175_vm4 = vcmp.lt.s32.totalorder %v156_v14, 1  ;;  %vm178_vm5 = vcmp.lt.s32.totalorder %v156_v14, 4 }
 0x11d   :  { %v161_v20 = vshrl.u32 %v1767_v17, %v158_v13  ;;  %v164_v22 = vshrl.u32 %v1768_v21, %v158_v13  ;;  %v167_v25 = vshrl.u32 %v1769_v24, %v158_v13  ;;  %v170_v28 = vshrl.u32 %v1770_v27, %v158_v13 }
 0x11e   :  { %v173_v31 = vshrl.u32 %v1771_v30, %v158_v13  ;;  %v159_v39 = vshrl.u32 %v1766_v15, %v158_v13  ;;  %vm177_vm6 = vcmp.lt.s32.totalorder %v156_v14, 3  ;;  %vm176_vm8 = vcmp.lt.s32.totalorder %v156_v14, 2 }
 0x11f   :  { %v162_v32 = vor.u32 %v161_v20, %v160_v16  ;;  %v165_v33 = vor.u32 %v164_v22, %v163_v18  ;;  %v168_v34 = vor.u32 %v167_v25, %v166_v23  ;;  %v1705_v36 = vpop.eup %1704  ;;  %v171_v37 = vor.u32 %v170_v28, %v169_v26 }
 0x120   :  { %v174_v38 = vor.u32 %v173_v31, %v172_v29  ;;  %v260_v45 = vadd.f32 1.0, %v1705_v36  ;;  %v1876_v54 = vpop.eup %1706 }
 0x121   :  { %v180_v40 = vsel %vm178_vm5, %v168_v34, 2102212464  ;;  %v183_v41 = vsel %vm175_vm4, %v162_v32, %v165_v33  ;;  %v187_v42 = vsel %vm175_vm4, %v165_v33, %v168_v34  ;;  %v184_v43 = vsel %vm178_vm5, %v171_v37, 920167782 }
 0x122   :  { %v188_v44 = vsel %vm178_vm5, %v174_v38, 1326507024  ;;  %v179_v47 = vsel %vm175_vm4, %v159_v39, %v162_v32  ;;  %v185_v48 = vsel %vm177_vm6, %v168_v34, %v184_v43  ;;  %v181_v50 = vsel %vm177_vm6, %v165_v33, %v180_v40 }
 0x123   :  { %v189_v49 = vsel %vm177_vm6, %v171_v37, %v188_v44  ;;  %v186_v51 = vsel %vm176_vm8, %v183_v41, %v185_v48  ;;  %v1874_v53 = vmul.f32 %v260_v45, %v253_v19  ;;  %v182_v61 = vsel %vm176_vm8, %v179_v47, %v181_v50 }
 0x124   :  { %v190_v52 = vsel %vm176_vm8, %v187_v42, %v189_v49  ;;  %v1881_v57 = vmul.u32.u64.low %v191_v35, %v186_v51  ;;  %v1882_v58 = vmul.u32.u64.high %v191_v35, %v186_v51, %v1881_v57  ;;  %v198_v63 = vmul.u32 %v191_v35, %v182_v61 }
 0x125   :  { %v1878_v55 = vmul.u32.u64.low %v191_v35, %v190_v52  ;;  %v1879_v56 = vmul.u32.u64.high %v191_v35, %v190_v52, %v1878_v55  ;;  %v262_v60 = vsel %vm1870_vm7, %v1876_v54, %v1874_v53  ;;  %v491_v52 = vld [vmem:[#allocation2 + $0x100] sm:$0xff]  ;;  %v492_v53 = vld [vmem:[#allocation2 + $0x108] sm:$0xff]  ;;  %v493_v54 = vld [vmem:[#allocation2 + $0x110] sm:$0xff] }
 0x126   :  { %v201_v62 = vadd.s32 1, %v1882_v58  ;;  %v1561_v55 = vpack.c.bf16 %v492_v53, %v491_v52 }
 0x127   :  { %vm200_vm9 = vc.u32 %v1879_v56, %v1881_v57  ;;  %v199_v16 = vadd.s32 %v1881_v57, %v1879_v56  ;;  %v494_v56 = vld [vmem:[#allocation2 + $0x118] sm:$0xff] }
 0x128   :  { %v202_v2 = vsel %vm200_vm9, %v201_v62, %v1882_v58  ;;  %1562 = vmatpush3.bf16.msra.mxu0 %v1561_v55  ;;  %v1564_v57 = vpack.c.bf16 %v494_v56, %v493_v54  ;;  %v496_v58 = vld [vmem:[#allocation2 + $0x128] sm:$0xff]  ;;  %v498_v62 = vld [vmem:[#allocation2 + $0x138] sm:$0xff] }
 0x129   :  { %v203_v3 = vadd.s32 %v202_v2, %v198_v63  ;;  %1563 = vmatprep.subr.bf16.mxu0 %v1763_v0  ;;  %v499_v2 = vld [vmem:[#allocation2 + $0x140] sm:$0xff] }
 0x12b   :  { %v204_v5 = vadd.s32 536870912, %v203_v3 }
 0x12c   :  { %1565 = vmatpush3.bf16.msra.mxu0 %v1564_v57 }
 0x12d   :  { %v205_v7 = vshrl.u32 %v204_v5, 30  ;;  %1566 = vmatprep.subr.bf16.mxu0 %v1763_v0 }
 0x12f   :  { %v206_v8 = vshll.u32 %v205_v7, 30  ;;  %v229_v33 = vsub.s32 4, %v205_v7 }
 0x131   :  { %v207_v9 = vsub.s32 %v203_v3, %v206_v8  ;;  %v230_v36 = vsel %vm145_vm11, %v229_v33, %v205_v7  ;;  %v500_v3 = vld [vmem:[#allocation2 + $0x148] sm:$0xff]  ;;  %v501_v7 = vld [vmem:[#allocation2 + $0x150] sm:$0xff]  ;;  %v502_v8 = vld [vmem:[#allocation2 + $0x158] sm:$0xff] }
 0x132   :  { %v232_v38 = vsel %vm144_vm12, 0, %v230_v36  ;;  %v1573_v5 = vpack.c.bf16 %v500_v3, %v499_v2 }
 0x133   :  { %v209_v10 = vsub.s32 0, %v207_v9  ;;  %v236_v39 = vadd.s32 3, %v232_v38 }
 0x135   :  { %v1124_v11 = vmin.u32 %v209_v10, %v207_v9  ;;  %v237_v40 = vand.u32 3, %v236_v39  ;;  %v503_v10 = vld [vmem:[#allocation2 + $0x160] sm:$0xff] }
 0x137   :  { %v211_v12 = vclz %v1124_v11  ;;  %vm242_vm13 = vcmp.eq.s32.totalorder %v237_v40, 2  ;;  %vm239_vm14 = vcmp.eq.s32.totalorder %v237_v40, 0  ;;  %vm238_vm15 = vcmp.lt.s32.totalorder %v237_v40, 2  ;;  %v504_v11 = vld [vmem:[#allocation2 + $0x168] sm:$0xff] }
 0x139   :  { %v1125_v13 = vadd.s32 4294967294, %v211_v12  ;;  %v1579_v12 = vpack.c.bf16 %v504_v11, %v503_v10 }
 0x13b   :  { %vm1126_vm10 = vcmp.lt.s32.totalorder %v1125_v13, 0 }
 0x13c   :  { %v214_v14 = vsel %vm1126_vm10, 0, %v1125_v13  ;;  %v505_v13 = vld [vmem:[#allocation2 + $0x170] sm:$0xff] }
 0x13d   :  { %v215_v18 = vsub.s32 32, %v214_v14  ;;  %v219_v19 = vsub.s32 4294967266, %v214_v14  ;;  %v216_v20 = vshll.u32 %v207_v9, %v214_v14  ;;  %v1576_v9 = vpack.c.bf16 %v502_v8, %v501_v7  ;;  %v506_v14 = vld [vmem:[#allocation2 + $0x178] sm:$0xff] }
 0x13f   :  { %v217_v22 = vshrl.u32 %v199_v16, %v215_v18  ;;  %v220_v23 = vadd.s32 127, %v219_v19  ;;  %v1582_v16 = vpack.c.bf16 %v506_v14, %v505_v13  ;;  %v1128_v18 = vld [vmem:[%s2073_s2 + $0x1] ss:$0 sm:$0xff] }
 0x141   :  { %v218_v25 = vor.u32 %v217_v22, %v216_v20  ;;  %v221_v26 = vshll.u32 %v220_v23, 23  ;;  %v1129_v20 = vld [vmem:[%s2074_s3 + $0x4] ss:$0 sm:$0xff] }
 0x143   :  { %v222_v28 = vor.u32 4788187, %v221_v26  ;;  %v225_v31 = vcvt.s32.f32 %v218_v25  ;;  %v1130_v25 = vld [vmem:[%s2074_s3 + $0x5] ss:$0 sm:$0xff] }
 0x145   :  { %v223_v29 = vand.u32 2147483647, %v222_v28 }
 0x147   :  { %v226_v32 = vmul.f32 %v225_v31, %v223_v29 }
 0x149   :  { %v227_v34 = vxor.u32 2147483648, %v226_v32 }
 0x14b   :  { %v228_v35 = vsel %vm145_vm11, %v227_v34, %v226_v32 }
 0x14c   :  { %v231_v37 = vsel %vm144_vm12, %v1845_v59, %v228_v35  ;;  %v495_v59 = vld [vmem:[#allocation2 + $0x120] sm:$0xff] }
 0x14d   :  { %1708 = vcosq.f32 %v231_v37  ;;  %v1567_v61 = vpack.c.bf16 %v496_v58, %v495_v59 }
 0x14e   :  { %1710 = vsinq.f32 %v231_v37 }
 0x14f   :  { %1568 = vmatpush3.bf16.msra.mxu0 %v1567_v61 }
 0x150   :  { %1569 = vmatprep.subr.bf16.mxu0 %v1763_v0 }
 0x157   :  { %v1709_v41 = vpop.eup %1708 }
 0x158   :  { %v1711_v42 = vpop.eup %1710  ;;  %v243_v43 = vxor.u32 2147483648, %v1709_v41 }
 0x159   :  { %v240_v44 = vxor.u32 2147483648, %v1711_v42 }
 0x15a   :  { %v244_v45 = vsel %vm242_vm13, %v243_v43, %v1711_v42 }
 0x15b   :  { %v241_v47 = vsel %vm239_vm14, %v1709_v41, %v240_v44 }
 0x15c   :  { %v245_v48 = vsel %vm238_vm15, %v241_v47, %v244_v45 }
 0x15d   :  { %v246_v49 = vsel %vm235_vm1, nan, %v245_v48 }
 0x15e   :  { %v251_v50 = vmul.f32 %v1127_v4, %v246_v49 }
 0x160   :  { %v263_v51 = vsel %vm33_vm2, %v251_v50, %v262_v60  ;;  %v497_v60 = vld [vmem:[#allocation2 + $0x130] sm:$0xff] }
 0x161   :  { %1335 = vmatmul.mubr.f32.vlgmr.msra.gmra.mrb[0].mxu1 %v263_v51  ;;  %v1570_v63 = vpack.c.bf16 %v498_v62, %v497_v60 }
 0x162   :  { %1404 = vmatprep.mubr.msk.f32.mxu1 %vm1764_vm0, %v1765_v1 }
 0x163   :  { %1571 = vmatpush3.bf16.msra.mxu0 %v1570_v63 }
 0x164   :  { %1572 = vmatprep.subr.bf16.mxu0 %v1763_v0 }
 0x167   :  { %1574 = vmatpush3.bf16.msra.mxu0 %v1573_v5 }
 0x168   :  { %1575 = vmatprep.subr.bf16.mxu0 %v1763_v0 }
 0x16b   :  { %1577 = vmatpush3.bf16.msra.mxu0 %v1576_v9 }
 0x16c   :  { %1578 = vmatprep.subr.bf16.mxu0 %v1763_v0 }
 0x16f   :  { %1580 = vmatpush3.bf16.msra.mxu0 %v1579_v12 }
 0x170   :  { %1581 = vmatprep.subr.bf16.mxu0 %v1763_v0 }
 0x173   :  { %1583 = vmatpush3.bf16.msra.mxu0 %v1582_v16 }
 0x174   :  { %1608 = vmatprep.subr.bf16.mxu0 %v1763_v0 }
 0x234   :  { %v352_v19 = vpop.f32.mrb[0].mxu1 }
 0x235   :  { %v353_v22 = vadd.f32 %v1128_v18, %v352_v19  ;;  %v1336_v23 = vpop.f32.mrb[1].mxu1 }
 0x237   :  { %v363_v26 = vmul.f32 %v1129_v20, %v353_v22  ;;  %v480_v28 = vmul.f32 0.044715, %v353_v22  ;;  %v479_v48 = vmul.f32 0.5, %v353_v22 }
 0x239   :  { %v1922_v29 = vadd.f32 %v1130_v25, %v363_v26  ;;  %v481_v31 = vmul.f32 %v480_v28, %v353_v22 }
 0x23b   :  { %v372_v32 = vand.u32 2139095040, %v1922_v29  ;;  %v482_v33 = vmul.f32 %v481_v31, %v353_v22  ;;  %v369_v36 = vand.u32 2147483647, %v1922_v29  ;;  %vm371_vm11 = vcmp.lt.s32.totalorder %v1922_v29, 0 }
 0x23c   :  { %vm461_vm1 = vweird.f32 %v1922_v29 }
 0x23d   :  { %v373_v34 = vshrl.u32 %v372_v32, 23  ;;  %v483_v35 = vadd.f32 %v482_v33, %v353_v22  ;;  %v376_v40 = vand.u32 8388607, %v369_v36  ;;  %vm370_vm12 = vcmp.le.f32.partialorder %v369_v36, 0.7853982 }
 0x23e   :  { %v1135_v36 = vld [vmem:[%s2074_s3 + $0x3] ss:$0 sm:$0xff] }
 0x23f   :  { %v1131_v37 = vadd.s32 4294967169, %v373_v34  ;;  %v484_v38 = vmul.f32 0.7978846, %v483_v35  ;;  %v377_v43 = vor.u32 8388608, %v376_v40 }
 0x241   :  { %v379_v39 = vadd.s32 1, %v1131_v37  ;;  %1712 = vtanh.f32 %v484_v38  ;;  %v417_v61 = vshll.u32 %v377_v43, 8 }
 0x242   :  { %1714 = vtanh.f32 %v353_v22 }
 0x243   :  { %vm380_vm3 = vcmp.gt.s32.totalorder %v379_v39, 0 }
 0x244   :  { %v381_v41 = vsel %vm380_vm3, %v379_v39, 0 }
 0x245   :  { %v383_v42 = vand.u32 31, %v381_v41  ;;  %v382_v45 = vshrl.u32 %v381_v41, 5 }
 0x247   :  { %v384_v44 = vsub.s32 32, %v383_v42  ;;  %v386_v4 = vshll.u32 %v1766_v15, %v383_v42  ;;  %v389_v47 = vshll.u32 %v1767_v17, %v383_v42  ;;  %v392_v51 = vshll.u32 %v1768_v21, %v383_v42 }
 0x248   :  { %v395_v53 = vshll.u32 %v1769_v24, %v383_v42  ;;  %v398_v55 = vshll.u32 %v1770_v27, %v383_v42  ;;  %vm401_vm4 = vcmp.lt.s32.totalorder %v382_v45, 1  ;;  %vm404_vm5 = vcmp.lt.s32.totalorder %v382_v45, 4 }
 0x249   :  { %v387_v49 = vshrl.u32 %v1767_v17, %v384_v44  ;;  %v390_v50 = vshrl.u32 %v1768_v21, %v384_v44  ;;  %v393_v52 = vshrl.u32 %v1769_v24, %v384_v44  ;;  %v396_v54 = vshrl.u32 %v1770_v27, %v384_v44 }
 0x24a   :  { %v399_v56 = vshrl.u32 %v1771_v30, %v384_v44  ;;  %v385_v2 = vshrl.u32 %v1766_v15, %v384_v44  ;;  %vm403_vm6 = vcmp.lt.s32.totalorder %v382_v45, 3  ;;  %vm402_vm8 = vcmp.lt.s32.totalorder %v382_v45, 2 }
 0x24b   :  { %v388_v57 = vor.u32 %v387_v49, %v386_v4  ;;  %v391_v59 = vor.u32 %v390_v50, %v389_v47  ;;  %v394_v58 = vor.u32 %v393_v52, %v392_v51  ;;  %v1713_v60 = vpop.eup %1712  ;;  %v397_v62 = vor.u32 %v396_v54, %v395_v53 }
 0x24c   :  { %v400_v63 = vor.u32 %v399_v56, %v398_v55  ;;  %v486_v10 = vadd.f32 1.0, %v1713_v60  ;;  %v1715_v20 = vpop.eup %1714 }
 0x24d   :  { %v406_v3 = vsel %vm404_vm5, %v394_v58, 2102212464  ;;  %v409_v5 = vsel %vm401_vm4, %v388_v57, %v391_v59  ;;  %v413_v7 = vsel %vm401_vm4, %v391_v59, %v394_v58  ;;  %v410_v8 = vsel %vm404_vm5, %v397_v62, 920167782 }
 0x24e   :  { %v414_v9 = vsel %vm404_vm5, %v400_v63, 1326507024  ;;  %v405_v11 = vsel %vm401_vm4, %v385_v2, %v388_v57  ;;  %v411_v12 = vsel %vm403_vm6, %v394_v58, %v410_v8  ;;  %v407_v14 = vsel %vm403_vm6, %v391_v59, %v406_v3 }
 0x24f   :  { %v415_v13 = vsel %vm403_vm6, %v397_v62, %v414_v9  ;;  %v412_v16 = vsel %vm402_vm8, %v409_v5, %v411_v12  ;;  %v1939_v19 = vmul.f32 %v486_v10, %v479_v48  ;;  %v408_v31 = vsel %vm402_vm8, %v405_v11, %v407_v14 }
 0x250   :  { %v416_v18 = vsel %vm402_vm8, %v413_v7, %v415_v13  ;;  %v1944_v25 = vmul.u32.u64.low %v417_v61, %v412_v16  ;;  %v1945_v26 = vmul.u32.u64.high %v417_v61, %v412_v16, %v1944_v25  ;;  %v424_v33 = vmul.u32 %v417_v61, %v408_v31 }
 0x251   :  { %v1941_v22 = vmul.u32.u64.low %v417_v61, %v416_v18  ;;  %v1942_v23 = vmul.u32.u64.high %v417_v61, %v416_v18, %v1941_v22  ;;  %v488_v28 = vsel %vm1870_vm7, %v1715_v20, %v1939_v19  ;;  %v717_v18 = vld [vmem:[#allocation2 + $0x180] sm:$0xff]  ;;  %v718_v19 = vld [vmem:[#allocation2 + $0x188] sm:$0xff]  ;;  %v719_v20 = vld [vmem:[#allocation2 + $0x190] sm:$0xff] }
 0x252   :  { %v427_v32 = vadd.s32 1, %v1945_v26  ;;  %v1585_v22 = vpack.c.bf16 %v718_v19, %v717_v18 }
 0x253   :  { %vm426_vm9 = vc.u32 %v1942_v23, %v1944_v25  ;;  %v425_v4 = vadd.s32 %v1944_v25, %v1942_v23  ;;  %v720_v23 = vld [vmem:[#allocation2 + $0x198] sm:$0xff] }
 0x254   :  { %v428_v34 = vsel %vm426_vm9, %v427_v32, %v1945_v26  ;;  %1586 = vmatpush3.bf16.msra.mxu1 %v1585_v22  ;;  %v1588_v25 = vpack.c.bf16 %v720_v23, %v719_v20  ;;  %v722_v26 = vld [vmem:[#allocation2 + $0x1a8] sm:$0xff]  ;;  %v724_v32 = vld [vmem:[#allocation2 + $0x1b8] sm:$0xff] }
 0x255   :  { %v429_v35 = vadd.s32 %v428_v34, %v424_v33  ;;  %1587 = vmatprep.subr.bf16.mxu1 %v1763_v0  ;;  %v725_v34 = vld [vmem:[#allocation2 + $0x1c0] sm:$0xff] }
 0x257   :  { %v430_v37 = vadd.s32 536870912, %v429_v35 }
 0x258   :  { %1589 = vmatpush3.bf16.msra.mxu1 %v1588_v25 }
 0x259   :  { %v431_v38 = vshrl.u32 %v430_v37, 30  ;;  %1590 = vmatprep.subr.bf16.mxu1 %v1763_v0 }
 0x25b   :  { %v432_v39 = vshll.u32 %v431_v38, 30  ;;  %v455_v59 = vsub.s32 4, %v431_v38 }
 0x25d   :  { %v433_v40 = vsub.s32 %v429_v35, %v432_v39  ;;  %v456_v60 = vsel %vm371_vm11, %v455_v59, %v431_v38  ;;  %v726_v35 = vld [vmem:[#allocation2 + $0x1c8] sm:$0xff]  ;;  %v727_v38 = vld [vmem:[#allocation2 + $0x1d0] sm:$0xff]  ;;  %v728_v39 = vld [vmem:[#allocation2 + $0x1d8] sm:$0xff] }
 0x25e   :  { %v458_v63 = vsel %vm370_vm12, 0, %v456_v60  ;;  %v1597_v37 = vpack.c.bf16 %v726_v35, %v725_v34 }
 0x25f   :  { %v435_v41 = vsub.s32 0, %v433_v40  ;;  %v462_v2 = vadd.s32 3, %v458_v63 }
 0x261   :  { %v1132_v42 = vmin.u32 %v435_v41, %v433_v40  ;;  %v463_v3 = vand.u32 3, %v462_v2  ;;  %v729_v41 = vld [vmem:[#allocation2 + $0x1e0] sm:$0xff] }
 0x263   :  { %v437_v43 = vclz %v1132_v42  ;;  %vm468_vm13 = vcmp.eq.s32.totalorder %v463_v3, 2  ;;  %vm465_vm14 = vcmp.eq.s32.totalorder %v463_v3, 0  ;;  %vm464_vm15 = vcmp.lt.s32.totalorder %v463_v3, 2  ;;  %v730_v42 = vld [vmem:[#allocation2 + $0x1e8] sm:$0xff] }
 0x265   :  { %v1133_v44 = vadd.s32 4294967294, %v437_v43  ;;  %v1603_v43 = vpack.c.bf16 %v730_v42, %v729_v41 }
 0x267   :  { %vm1134_vm10 = vcmp.lt.s32.totalorder %v1133_v44, 0 }
 0x268   :  { %v440_v45 = vsel %vm1134_vm10, 0, %v1133_v44  ;;  %v731_v44 = vld [vmem:[#allocation2 + $0x1f0] sm:$0xff] }
 0x269   :  { %v441_v47 = vsub.s32 32, %v440_v45  ;;  %v445_v48 = vsub.s32 4294967266, %v440_v45  ;;  %v442_v49 = vshll.u32 %v433_v40, %v440_v45  ;;  %v1600_v40 = vpack.c.bf16 %v728_v39, %v727_v38  ;;  %v732_v45 = vld [vmem:[#allocation2 + $0x1f8] sm:$0xff] }
 0x26b   :  { %v443_v50 = vshrl.u32 %v425_v4, %v441_v47  ;;  %v446_v51 = vadd.s32 127, %v445_v48  ;;  %v1606_v4 = vpack.c.bf16 %v732_v45, %v731_v44  ;;  %v819_v47 = vld [vmem:[#allocation2 + $0x200] sm:$0xff]  ;;  %v820_v48 = vld [vmem:[#allocation2 + $0x208] sm:$0xff] }
 0x26d   :  { %v444_v52 = vor.u32 %v443_v50, %v442_v49  ;;  %v447_v53 = vshll.u32 %v446_v51, 23  ;;  %v1609_v49 = vpack.c.bf16 %v820_v48, %v819_v47  ;;  %v1136_v50 = vld [vmem:[%s2073_s2 + $0x2] ss:$0 sm:$0xff] }
 0x26f   :  { %v448_v54 = vor.u32 4788187, %v447_v53  ;;  %v451_v56 = vcvt.s32.f32 %v444_v52  ;;  %v1137_v52 = vld [vmem:[%s2074_s3 + $0x7] ss:$0 sm:$0xff] }
 0x271   :  { %v449_v55 = vand.u32 2147483647, %v448_v54 }
 0x273   :  { %v452_v57 = vmul.f32 %v451_v56, %v449_v55  ;;  %v1138_v55 = vld [vmem:[%s2074_s3 + $0x8] ss:$0 sm:$0xff] }
 0x275   :  { %v453_v58 = vxor.u32 2147483648, %v452_v57 }
 0x277   :  { %v454_v61 = vsel %vm371_vm11, %v453_v58, %v452_v57 }
 0x278   :  { %v457_v62 = vsel %vm370_vm12, %v1922_v29, %v454_v61  ;;  %v721_v29 = vld [vmem:[#allocation2 + $0x1a0] sm:$0xff] }
 0x279   :  { %1716 = vcosq.f32 %v457_v62  ;;  %v1591_v31 = vpack.c.bf16 %v722_v26, %v721_v29 }
 0x27a   :  { %1718 = vsinq.f32 %v457_v62 }
 0x27b   :  { %1592 = vmatpush3.bf16.msra.mxu1 %v1591_v31 }
 0x27c   :  { %1593 = vmatprep.subr.bf16.mxu1 %v1763_v0 }
 0x283   :  { %v1717_v5 = vpop.eup %1716 }
 0x284   :  { %v1719_v7 = vpop.eup %1718  ;;  %v469_v8 = vxor.u32 2147483648, %v1717_v5 }
 0x285   :  { %v466_v9 = vxor.u32 2147483648, %v1719_v7 }
 0x286   :  { %v470_v10 = vsel %vm468_vm13, %v469_v8, %v1719_v7 }
 0x287   :  { %v467_v11 = vsel %vm465_vm14, %v1717_v5, %v466_v9 }
 0x288   :  { %v471_v12 = vsel %vm464_vm15, %v467_v11, %v470_v10 }
 0x289   :  { %v472_v13 = vsel %vm461_vm1, nan, %v471_v12 }
 0x28a   :  { %v477_v14 = vmul.f32 %v1135_v36, %v472_v13 }
 0x28c   :  { %v489_v16 = vsel %vm33_vm2, %v477_v14, %v488_v28  ;;  %v723_v28 = vld [vmem:[#allocation2 + $0x1b0] sm:$0xff] }
 0x28d   :  { %1370 = vmatmul.mubr.f32.vlgmr.msra.gmra.mrb[2].mxu0 %v489_v16  ;;  %v1594_v33 = vpack.c.bf16 %v724_v32, %v723_v28 }
 0x28e   :  { %1439 = vmatprep.mubr.msk.f32.mxu0 %vm1764_vm0, %v1765_v1  ;;  %1610 = vmatpush3.bf16.msra.mxu0 %v1609_v49 }
 0x28f   :  { %1595 = vmatpush3.bf16.msra.mxu1 %v1594_v33  ;;  %1611 = vmatprep.subr.bf16.mxu0 %v1763_v0 }
 0x290   :  { %1596 = vmatprep.subr.bf16.mxu1 %v1763_v0 }
 0x293   :  { %1598 = vmatpush3.bf16.msra.mxu1 %v1597_v37 }
 0x294   :  { %1599 = vmatprep.subr.bf16.mxu1 %v1763_v0 }
 0x297   :  { %1601 = vmatpush3.bf16.msra.mxu1 %v1600_v40 }
 0x298   :  { %1602 = vmatprep.subr.bf16.mxu1 %v1763_v0 }
 0x29b   :  { %1604 = vmatpush3.bf16.msra.mxu1 %v1603_v43 }
 0x29c   :  { %1605 = vmatprep.subr.bf16.mxu1 %v1763_v0 }
 0x29f   :  { %1607 = vmatpush3.bf16.msra.mxu1 %v1606_v4 }
 0x2a0   :  { %1632 = vmatprep.subr.bf16.mxu1 %v1763_v0 }
 0x360   :  { %v578_v51 = vpop.f32.mrb[2].mxu0 }
 0x361   :  { %v579_v53 = vadd.f32 %v1136_v50, %v578_v51  ;;  %v1371_v54 = vpop.f32.mrb[3].mxu0 }
 0x363   :  { %v589_v56 = vmul.f32 %v1137_v52, %v579_v53  ;;  %v706_v57 = vmul.f32 0.044715, %v579_v53  ;;  %v705_v16 = vmul.f32 0.5, %v579_v53 }
 0x365   :  { %v1984_v59 = vadd.f32 %v1138_v55, %v589_v56  ;;  %v707_v58 = vmul.f32 %v706_v57, %v579_v53 }
 0x367   :  { %v598_v61 = vand.u32 2139095040, %v1984_v59  ;;  %v708_v60 = vmul.f32 %v707_v58, %v579_v53  ;;  %v595_v2 = vand.u32 2147483647, %v1984_v59  ;;  %vm687_vm15 = vweird.f32 %v1984_v59 }
 0x369   :  { %v599_v62 = vshrl.u32 %v598_v61, 23  ;;  %v709_v63 = vadd.f32 %v708_v60, %v579_v53  ;;  %v602_v8 = vand.u32 8388607, %v595_v2  ;;  %vm596_vm11 = vcmp.le.f32.partialorder %v595_v2, 0.7853982 }
 0x36a   :  { %v1143_v2 = vld [vmem:[%s2074_s3 + $0x6] ss:$0 sm:$0xff] }
 0x36b   :  { %v1139_v3 = vadd.s32 4294967169, %v599_v62  ;;  %v710_v5 = vmul.f32 0.7978846, %v709_v63  ;;  %v603_v36 = vor.u32 8388608, %v602_v8 }
 0x36d   :  { %v605_v7 = vadd.s32 1, %v1139_v3  ;;  %1720 = vtanh.f32 %v710_v5  ;;  %v643_v33 = vshll.u32 %v603_v36, 8 }
 0x36e   :  { %1722 = vtanh.f32 %v579_v53 }
 0x36f   :  { %vm606_vm3 = vcmp.gt.s32.totalorder %v605_v7, 0 }
 0x370   :  { %v607_v9 = vsel %vm606_vm3, %v605_v7, 0 }
 0x371   :  { %v609_v10 = vand.u32 31, %v607_v9  ;;  %v608_v12 = vshrl.u32 %v607_v9, 5 }
 0x373   :  { %v610_v11 = vsub.s32 32, %v609_v10  ;;  %v612_v13 = vshll.u32 %v1766_v15, %v609_v10  ;;  %v615_v14 = vshll.u32 %v1767_v17, %v609_v10  ;;  %v618_v20 = vshll.u32 %v1768_v21, %v609_v10 }
 0x374   :  { %v621_v23 = vshll.u32 %v1769_v24, %v609_v10  ;;  %v624_v29 = vshll.u32 %v1770_v27, %v609_v10  ;;  %vm627_vm4 = vcmp.lt.s32.totalorder %v608_v12, 1  ;;  %vm630_vm5 = vcmp.lt.s32.totalorder %v608_v12, 4 }
 0x375   :  { %v613_v18 = vshrl.u32 %v1767_v17, %v610_v11  ;;  %v616_v19 = vshrl.u32 %v1768_v21, %v610_v11  ;;  %v619_v22 = vshrl.u32 %v1769_v24, %v610_v11  ;;  %v622_v25 = vshrl.u32 %v1770_v27, %v610_v11 }
 0x376   :  { %v625_v26 = vshrl.u32 %v1771_v30, %v610_v11  ;;  %v611_v21 = vshrl.u32 %v1766_v15, %v610_v11  ;;  %vm629_vm6 = vcmp.lt.s32.totalorder %v608_v12, 3  ;;  %vm628_vm8 = vcmp.lt.s32.totalorder %v608_v12, 2 }
 0x377   :  { %v614_v31 = vor.u32 %v613_v18, %v612_v13  ;;  %v617_v28 = vor.u32 %v616_v19, %v615_v14  ;;  %v620_v32 = vor.u32 %v619_v22, %v618_v20  ;;  %v1721_v34 = vpop.eup %1720  ;;  %v623_v17 = vor.u32 %v622_v25, %v621_v23 }
 0x378   :  { %v626_v35 = vor.u32 %v625_v26, %v624_v29  ;;  %v712_v27 = vadd.f32 1.0, %v1721_v34  ;;  %v1723_v47 = vpop.eup %1722 }
 0x379   :  { %v632_v37 = vsel %vm630_vm5, %v620_v32, 2102212464  ;;  %v635_v38 = vsel %vm627_vm4, %v614_v31, %v617_v28  ;;  %v639_v24 = vsel %vm627_vm4, %v617_v28, %v620_v32  ;;  %v636_v39 = vsel %vm630_vm5, %v623_v17, 920167782 }
 0x37a   :  { %v640_v40 = vsel %vm630_vm5, %v626_v35, 1326507024  ;;  %v631_v30 = vsel %vm627_vm4, %v611_v21, %v614_v31  ;;  %v637_v41 = vsel %vm629_vm6, %v620_v32, %v636_v39  ;;  %v633_v43 = vsel %vm629_vm6, %v617_v28, %v632_v37 }
 0x37b   :  { %v641_v42 = vsel %vm629_vm6, %v623_v17, %v640_v40  ;;  %v638_v44 = vsel %vm628_vm8, %v635_v38, %v637_v41  ;;  %v2001_v4 = vmul.f32 %v712_v27, %v705_v16  ;;  %v634_v52 = vsel %vm628_vm8, %v631_v30, %v633_v43  ;;  %v821_v40 = vld [vmem:[#allocation2 + $0x210] sm:$0xff]  ;;  %v822_v27 = vld [vmem:[#allocation2 + $0x218] sm:$0xff]  ;;  %v823_v41 = vld [vmem:[#allocation2 + $0x220] sm:$0xff] }
 0x37c   :  { %v642_v45 = vsel %vm628_vm8, %v639_v24, %v641_v42  ;;  %v2006_v15 = vmul.u32.u64.low %v643_v33, %v638_v44  ;;  %v2007_v50 = vmul.u32.u64.high %v643_v33, %v638_v44, %v2006_v15  ;;  %v650_v54 = vmul.u32 %v643_v33, %v634_v52  ;;  %v824_v42 = vld [vmem:[#allocation2 + $0x228] sm:$0xff]  ;;  %v826_v44 = vld [vmem:[#allocation2 + $0x238] sm:$0xff] }
 0x37d   :  { %v2003_v48 = vmul.u32.u64.low %v643_v33, %v642_v45  ;;  %v2004_v49 = vmul.u32.u64.high %v643_v33, %v642_v45, %v2003_v48  ;;  %v714_v51 = vsel %vm1870_vm7, %v1723_v47, %v2001_v4  ;;  %vm597_vm7 = vcmp.lt.s32.totalorder %v1984_v59, 0  ;;  %v827_v4 = vld [vmem:[#allocation2 + $0x240] sm:$0xff]  ;;  %v828_v47 = vld [vmem:[#allocation2 + $0x248] sm:$0xff] }
 0x37e   :  { %v653_v53 = vadd.s32 1, %v2007_v50  ;;  %v1612_v30 = vpack.c.bf16 %v822_v27, %v821_v40  ;;  %v1615_v43 = vpack.c.bf16 %v824_v42, %v823_v41  ;;  %v1621_v48 = vpack.c.bf16 %v828_v47, %v827_v4  ;;  %v832_v52 = vld [vmem:[#allocation2 + $0x268] sm:$0xff]  ;;  %v1145_v40 = vld [vmem:[%s2073_s2 + $0x4] ss:$0 sm:$0xff] }
 0x37f   :  { %vm652_vm9 = vc.u32 %v2004_v49, %v2006_v15  ;;  %v651_v7 = vadd.s32 %v2006_v15, %v2004_v49  ;;  %v829_v49 = vld [vmem:[#allocation2 + $0x250] sm:$0xff]  ;;  %v830_v15 = vld [vmem:[#allocation2 + $0x258] sm:$0xff] }
 0x380   :  { %v654_v55 = vsel %vm652_vm9, %v653_v53, %v2007_v50  ;;  %1613 = vmatpush3.bf16.msra.mxu0 %v1612_v30  ;;  %v1624_v50 = vpack.c.bf16 %v830_v15, %v829_v49 }
 0x381   :  { %v655_v56 = vadd.s32 %v654_v55, %v650_v54  ;;  %1614 = vmatprep.subr.bf16.mxu0 %v1763_v0  ;;  %v833_v54 = vld [vmem:[#allocation2 + $0x270] sm:$0xff]  ;;  %v834_v55 = vld [vmem:[#allocation2 + $0x278] sm:$0xff] }
 0x383   :  { %v656_v57 = vadd.s32 536870912, %v655_v56 }
 0x384   :  { %1616 = vmatpush3.bf16.msra.mxu0 %v1615_v43 }
 0x385   :  { %v657_v58 = vshrl.u32 %v656_v57, 30  ;;  %1617 = vmatprep.subr.bf16.mxu0 %v1763_v0  ;;  %v921_v57 = vld [vmem:[#allocation2 + $0x280] sm:$0xff] }
 0x387   :  { %v658_v61 = vshll.u32 %v657_v58, 30  ;;  %v681_v20 = vsub.s32 4, %v657_v58 }
 0x389   :  { %v659_v60 = vsub.s32 %v655_v56, %v658_v61  ;;  %v682_v25 = vsel %vm597_vm7, %v681_v20, %v657_v58  ;;  %v1630_v56 = vpack.c.bf16 %v834_v55, %v833_v54  ;;  %v922_v58 = vld [vmem:[#allocation2 + $0x288] sm:$0xff] }
 0x38a   :  { %v684_v26 = vsel %vm596_vm11, 0, %v682_v25  ;;  %v1633_v61 = vpack.c.bf16 %v922_v58, %v921_v57  ;;  %v926_v20 = vld [vmem:[#allocation2 + $0x2a8] sm:$0xff]  ;;  %v928_v25 = vld [vmem:[#allocation2 + $0x2b8] sm:$0xff] }
 0x38b   :  { %v661_v62 = vsub.s32 0, %v659_v60  ;;  %v688_v31 = vadd.s32 3, %v684_v26  ;;  %v929_v26 = vld [vmem:[#allocation2 + $0x2c0] sm:$0xff]  ;;  %v1027_v54 = vld [vmem:[#allocation2 + $0x328] sm:$0xff]  ;;  %v1029_v57 = vld [vmem:[#allocation2 + $0x338] sm:$0xff] }
 0x38d   :  { %v1140_v63 = vmin.u32 %v661_v62, %v659_v60  ;;  %v689_v28 = vand.u32 3, %v688_v31  ;;  %v930_v31 = vld [vmem:[#allocation2 + $0x2c8] sm:$0xff] }
 0x38f   :  { %v663_v3 = vclz %v1140_v63  ;;  %vm694_vm12 = vcmp.eq.s32.totalorder %v689_v28, 2  ;;  %vm691_vm13 = vcmp.eq.s32.totalorder %v689_v28, 0  ;;  %vm690_vm14 = vcmp.lt.s32.totalorder %v689_v28, 2 }
 0x390   :  { %v1645_v28 = vpack.c.bf16 %v930_v31, %v929_v26 }
 0x391   :  { %v1141_v5 = vadd.s32 4294967294, %v663_v3 }
 0x393   :  { %vm1142_vm10 = vcmp.lt.s32.totalorder %v1141_v5, 0 }
 0x394   :  { %v666_v46 = vsel %vm1142_vm10, 0, %v1141_v5 }
 0x395   :  { %v667_v8 = vsub.s32 32, %v666_v46  ;;  %v671_v9 = vsub.s32 4294967266, %v666_v46  ;;  %v668_v10 = vshll.u32 %v659_v60, %v666_v46  ;;  %v1144_v60 = vld [vmem:[%s2073_s2 + $0x3] ss:$0 sm:$0xff] }
 0x397   :  { %v669_v36 = vshrl.u32 %v651_v7, %v667_v8  ;;  %v672_v11 = vadd.s32 127, %v671_v9 }
 0x399   :  { %v670_v12 = vor.u32 %v669_v36, %v668_v10  ;;  %v673_v13 = vshll.u32 %v672_v11, 23 }
 0x39b   :  { %v674_v14 = vor.u32 4788187, %v673_v13  ;;  %v677_v18 = vcvt.s32.f32 %v670_v12 }
 0x39d   :  { %v675_v16 = vand.u32 2147483647, %v674_v14  ;;  %v923_v14 = vld [vmem:[#allocation2 + $0x290] sm:$0xff] }
 0x39f   :  { %v678_v19 = vmul.f32 %v677_v18, %v675_v16  ;;  %v924_v16 = vld [vmem:[#allocation2 + $0x298] sm:$0xff] }
 0x3a0   :  { %v1636_v18 = vpack.c.bf16 %v924_v16, %v923_v14 }
 0x3a1   :  { %v679_v22 = vxor.u32 2147483648, %v678_v19 }
 0x3a3   :  { %v680_v23 = vsel %vm597_vm7, %v679_v22, %v678_v19  ;;  %v925_v19 = vld [vmem:[#allocation2 + $0x2a0] sm:$0xff] }
 0x3a4   :  { %v683_v29 = vsel %vm596_vm11, %v1984_v59, %v680_v23  ;;  %v825_v59 = vld [vmem:[#allocation2 + $0x230] sm:$0xff]  ;;  %v1639_v22 = vpack.c.bf16 %v926_v20, %v925_v19 }
 0x3a5   :  { %1724 = vcosq.f32 %v683_v29  ;;  %v1618_v45 = vpack.c.bf16 %v826_v44, %v825_v59  ;;  %v927_v23 = vld [vmem:[#allocation2 + $0x2b0] sm:$0xff] }
 0x3a6   :  { %1726 = vsinq.f32 %v683_v29  ;;  %v1642_v29 = vpack.c.bf16 %v928_v25, %v927_v23 }
 0x3a7   :  { %1619 = vmatpush3.bf16.msra.mxu0 %v1618_v45 }
 0x3a8   :  { %1620 = vmatprep.subr.bf16.mxu0 %v1763_v0 }
 0x3ab   :  { %1622 = vmatpush3.bf16.msra.mxu0 %v1621_v48 }
 0x3ac   :  { %1623 = vmatprep.subr.bf16.mxu0 %v1763_v0 }
 0x3af   :  { %v1725_v32 = vpop.eup %1724  ;;  %1625 = vmatpush3.bf16.msra.mxu0 %v1624_v50  ;;  %v1024_v50 = vld [vmem:[#allocation2 + $0x310] sm:$0xff] }
 0x3b0   :  { %v1727_v33 = vpop.eup %1726  ;;  %v695_v34 = vxor.u32 2147483648, %v1725_v32  ;;  %1626 = vmatprep.subr.bf16.mxu0 %v1763_v0 }
 0x3b1   :  { %v692_v17 = vxor.u32 2147483648, %v1727_v33 }
 0x3b2   :  { %v696_v35 = vsel %vm694_vm12, %v695_v34, %v1727_v33  ;;  %v933_v34 = vld [vmem:[#allocation2 + $0x2e0] sm:$0xff] }
 0x3b3   :  { %v693_v21 = vsel %vm691_vm13, %v1725_v32, %v692_v17  ;;  %v932_v32 = vld [vmem:[#allocation2 + $0x2d8] sm:$0xff]  ;;  %v934_v17 = vld [vmem:[#allocation2 + $0x2e8] sm:$0xff] }
 0x3b4   :  { %v697_v37 = vsel %vm690_vm14, %v693_v21, %v696_v35  ;;  %v1651_v35 = vpack.c.bf16 %v934_v17, %v933_v34  ;;  %v936_v21 = vld [vmem:[#allocation2 + $0x2f8] sm:$0xff] }
 0x3b5   :  { %v698_v38 = vsel %vm687_vm15, nan, %v697_v37 }
 0x3b6   :  { %v703_v24 = vmul.f32 %v1143_v2, %v698_v38  ;;  %v935_v2 = vld [vmem:[#allocation2 + $0x2f0] sm:$0xff]  ;;  %v1022_v38 = vld [vmem:[#allocation2 + $0x300] sm:$0xff] }
 0x3b7   :  { %v1654_v37 = vpack.c.bf16 %v936_v21, %v935_v2 }
 0x3b8   :  { %v715_v39 = vsel %vm33_vm2, %v703_v24, %v714_v51  ;;  %v831_v51 = vld [vmem:[#allocation2 + $0x260] sm:$0xff]  ;;  %vm37_vm2 = vcmp.ge.s32.totalorder %v1849_v6, 96  ;;  %v1023_v24 = vld [vmem:[#allocation2 + $0x308] sm:$0xff] }
 0x3b9   :  { %1405 = vmatmul.mubr.f32.vlgmr.msra.gmra.mrb[2].mxu1 %v715_v39  ;;  %v1627_v53 = vpack.c.bf16 %v832_v52, %v831_v51  ;;  %v1657_v39 = vpack.c.bf16 %v1023_v24, %v1022_v38  ;;  %v1025_v51 = vld [vmem:[#allocation2 + $0x318] sm:$0xff] }
 0x3ba   :  { %1474 = vmatprep.mubr.msk.f32.mxu1 %vm1764_vm0, %v1765_v1  ;;  %1634 = vmatpush3.bf16.msra.mxu1 %v1633_v61  ;;  %v1660_v52 = vpack.c.bf16 %v1025_v51, %v1024_v50  ;;  %v1030_v61 = vld [vmem:[#allocation2 + $0x340] sm:$0xff] }
 0x3bb   :  { %1628 = vmatpush3.bf16.msra.mxu0 %v1627_v53  ;;  %1635 = vmatprep.subr.bf16.mxu1 %v1763_v0  ;;  %v1026_v53 = vld [vmem:[#allocation2 + $0x320] sm:$0xff] }
 0x3bc   :  { %1629 = vmatprep.subr.bf16.mxu0 %v1763_v0  ;;  %v1663_v55 = vpack.c.bf16 %v1027_v54, %v1026_v53 }
 0x3be   :  { %1637 = vmatpush3.bf16.msra.mxu1 %v1636_v18 }
 0x3bf   :  { %1631 = vmatpush3.bf16.msra.mxu0 %v1630_v56  ;;  %1638 = vmatprep.subr.bf16.mxu1 %v1763_v0  ;;  %v1028_v56 = vld [vmem:[#allocation2 + $0x330] sm:$0xff] }
 0x3c0   :  { %1656 = vmatprep.subr.bf16.mxu0 %v1763_v0  ;;  %v1666_v58 = vpack.c.bf16 %v1029_v57, %v1028_v56 }
 0x3c2   :  { %1640 = vmatpush3.bf16.msra.mxu1 %v1639_v22 }
 0x3c3   :  { %1641 = vmatprep.subr.bf16.mxu1 %v1763_v0 }
 0x3c6   :  { %1643 = vmatpush3.bf16.msra.mxu1 %v1642_v29 }
 0x3c7   :  { %1644 = vmatprep.subr.bf16.mxu1 %v1763_v0 }
 0x3ca   :  { %1646 = vmatpush3.bf16.msra.mxu1 %v1645_v28 }
 0x3cb   :  { %1647 = vmatprep.subr.bf16.mxu1 %v1763_v0 }
 0x48c   :  { %v804_v62 = vpop.f32.mrb[2].mxu1 }
 0x48d   :  { %v805_v63 = vadd.f32 %v1144_v60, %v804_v62  ;;  %v1406_v3 = vpop.f32.mrb[3].mxu1  ;;  %v1031_v60 = vld [vmem:[#allocation2 + $0x348] sm:$0xff]  ;;  %v1032_v62 = vld [vmem:[#allocation2 + $0x350] sm:$0xff] }
 0x48e   :  { %v1669_v6 = vpack.c.bf16 %v1031_v60, %v1030_v61 }
 0x48f   :  { %v809_v5 = vmul.f32 0.044715, %v805_v63  ;;  %v808_v36 = vmul.f32 0.5, %v805_v63 }
 0x491   :  { %v810_v46 = vmul.f32 %v809_v5, %v805_v63  ;;  %v1034_v5 = vld [vmem:[#allocation2 + $0x360] sm:$0xff] }
 0x493   :  { %v811_v7 = vmul.f32 %v810_v46, %v805_v63  ;;  %v1035_v46 = vld [vmem:[#allocation2 + $0x368] sm:$0xff] }
 0x495   :  { %v812_v8 = vadd.f32 %v811_v7, %v805_v63  ;;  %v1675_v7 = vpack.c.bf16 %v1035_v46, %v1034_v5 }
 0x497   :  { %v813_v9 = vmul.f32 0.7978846, %v812_v8  ;;  %v1036_v8 = vld [vmem:[#allocation2 + $0x370] sm:$0xff] }
 0x499   :  { %1728 = vtanh.f32 %v813_v9  ;;  %v1037_v9 = vld [vmem:[#allocation2 + $0x378] sm:$0xff] }
 0x4a3   :  { %v1729_v10 = vpop.eup %1728 }
 0x4a4   :  { %v815_v11 = vadd.f32 1.0, %v1729_v10  ;;  %v1678_v10 = vpack.c.bf16 %v1037_v9, %v1036_v8 }
 0x4a6   :  { %v816_v12 = vmul.f32 %v815_v11, %v808_v36  ;;  %v1146_v36 = vld [vmem:[%s2073_s2 + $0x5] ss:$0 sm:$0xff] }
 0x4a8   :  { %v817_v13 = vsel %vm37_vm2, %v816_v12, %v805_v63  ;;  %v1033_v63 = vld [vmem:[#allocation2 + $0x358] sm:$0xff] }
 0x4a9   :  { %1440 = vmatmul.mubr.f32.vlgmr.msra.gmra.mrb[4].mxu0 %v817_v13  ;;  %v1672_v3 = vpack.c.bf16 %v1033_v63, %v1032_v62 }
 0x4aa   :  { %1509 = vmatprep.mubr.msk.f32.mxu0 %vm1764_vm0, %v1765_v1  ;;  %v931_v1 = vld [vmem:[#allocation2 + $0x2d0] sm:$0xff]  ;;  %1658 = vmatpush3.bf16.msra.mxu0 %v1657_v39 }
 0x4ab   :  { %v1648_v33 = vpack.c.bf16 %v932_v32, %v931_v1  ;;  %1659 = vmatprep.subr.bf16.mxu0 %v1763_v0 }
 0x4ad   :  { %1649 = vmatpush3.bf16.msra.mxu1 %v1648_v33 }
 0x4ae   :  { %1650 = vmatprep.subr.bf16.mxu1 %v1763_v0  ;;  %1661 = vmatpush3.bf16.msra.mxu0 %v1660_v52 }
 0x4af   :  { %1662 = vmatprep.subr.bf16.mxu0 %v1763_v0 }
 0x4b1   :  { %1652 = vmatpush3.bf16.msra.mxu1 %v1651_v35 }
 0x4b2   :  { %1653 = vmatprep.subr.bf16.mxu1 %v1763_v0  ;;  %1664 = vmatpush3.bf16.msra.mxu0 %v1663_v55 }
 0x4b3   :  { %1665 = vmatprep.subr.bf16.mxu0 %v1763_v0 }
 0x4b5   :  { %1655 = vmatpush3.bf16.msra.mxu1 %v1654_v37 }
 0x4b6   :  { %1667 = vmatpush3.bf16.msra.mxu0 %v1666_v58 }
 0x4b7   :  { %1668 = vmatprep.subr.bf16.mxu0 %v1763_v0 }
 0x4ba   :  { %1670 = vmatpush3.bf16.msra.mxu0 %v1669_v6 }
 0x4bb   :  { %1671 = vmatprep.subr.bf16.mxu0 %v1763_v0 }
 0x4be   :  { %1673 = vmatpush3.bf16.msra.mxu0 %v1672_v3 }
 0x4bf   :  { %1674 = vmatprep.subr.bf16.mxu0 %v1763_v0 }
 0x4c2   :  { %1676 = vmatpush3.bf16.msra.mxu0 %v1675_v7 }
 0x4c3   :  { %1677 = vmatprep.subr.bf16.mxu0 %v1763_v0  ;;  %v1147_v0 = vld [vmem:[%s2073_s2 + $0x6] ss:$0 sm:$0xff] }
 0x4c6   :  { %1679 = vmatpush3.bf16.msra.mxu0 %v1678_v10 }
 0x57c   :  { %v906_v27 = vpop.f32.mrb[4].mxu0 }
 0x57d   :  { %v907_v30 = vadd.f32 %v1145_v40, %v906_v27  ;;  %v1441_v41 = vpop.f32.mrb[5].mxu0 }
 0x57f   :  { %v911_v42 = vmul.f32 0.044715, %v907_v30  ;;  %v910_v47 = vmul.f32 0.5, %v907_v30 }
 0x581   :  { %v912_v43 = vmul.f32 %v911_v42, %v907_v30 }
 0x583   :  { %v913_v59 = vmul.f32 %v912_v43, %v907_v30 }
 0x585   :  { %v914_v44 = vadd.f32 %v913_v59, %v907_v30 }
 0x587   :  { %v915_v45 = vmul.f32 0.7978846, %v914_v44 }
 0x589   :  { %1730 = vtanh.f32 %v915_v45 }
 0x593   :  { %v1731_v4 = vpop.eup %1730 }
 0x594   :  { %v917_v48 = vadd.f32 1.0, %v1731_v4 }
 0x596   :  { %v918_v49 = vmul.f32 %v917_v48, %v910_v47 }
 0x598   :  { %v919_v15 = vsel %vm37_vm2, %v918_v49, %v907_v30 }
 0x599   :  { %1475 = vmatmul.mubr.f32.vlgmr.msra.gmra.mrb[4].mxu1 %v919_v15 }
 0x66c   :  { %v1008_v11 = vpop.f32.mrb[4].mxu1 }
 0x66d   :  { %v1009_v12 = vadd.f32 %v1146_v36, %v1008_v11  ;;  %v1476_v13 = vpop.f32.mrb[5].mxu1 }
 0x66f   :  { %v1013_v14 = vmul.f32 0.044715, %v1009_v12  ;;  %v1012_v23 = vmul.f32 0.5, %v1009_v12 }
 0x671   :  { %v1014_v16 = vmul.f32 %v1013_v14, %v1009_v12 }
 0x673   :  { %v1015_v18 = vmul.f32 %v1014_v16, %v1009_v12 }
 0x675   :  { %v1016_v19 = vadd.f32 %v1015_v18, %v1009_v12 }
 0x677   :  { %v1017_v20 = vmul.f32 0.7978846, %v1016_v19 }
 0x679   :  { %1732 = vtanh.f32 %v1017_v20 }
 0x683   :  { %v1733_v22 = vpop.eup %1732 }
 0x684   :  { %v1019_v25 = vadd.f32 1.0, %v1733_v22 }
 0x686   :  { %v1020_v29 = vmul.f32 %v1019_v25, %v1012_v23 }
 0x688   :  { %1510 = vmatmul.mubr.f32.vlgmr.msra.gmra.mrb[6].mxu0 %v1020_v29 }
 0x75b   :  { %v1109_v26 = vpop.f32.mrb[6].mxu0 }
 0x75c   :  { %v1110_v31 = vadd.f32 %v1147_v0, %v1109_v26  ;;  %v1511_v28 = vpop.f32.mrb[7].mxu0 }
 0x75e   :  { %1734 = vtanh.f32 %v1110_v31 }
 0x768   :  { %v1735_v1 = vpop.eup %1734 }
 0x769   :  { %1114 = vst [vmem:[%s2075_s4] sm:$0xff] %v1735_v1 }
 0x76a   :  { %1119 = vsyncpa [#allocation3], 1 }

</bundles_post_ra>
